<compile_context>
chip_gen: v6e
topology: v6e:2x2x1
jax: 0.10.0
libtpu: 0.0.40
codegen_flags: <defaults>
</compile_context>

<pallas_src>
import functools

import jax
import jax.numpy as jnp
from jax.experimental import pallas as pl
from jax.experimental.pallas import tpu as pltpu


def _round_up(x, m):
    return (x + m - 1) // m * m


def _scorer_kernel(x_ref, wt_ref, b_ref, o_ref, *, binarize):
    # x_ref : (tb, E)  native dtype (f32/bf16) — the only operand whose HBM traffic matters
    # wt_ref: (E, H)   native dtype (nn.Linear weight pre-transposed in the wrapper)
    # b_ref : (1, H)   f32
    # o_ref : (tb, H)  f32
    logits = jnp.dot(x_ref[...], wt_ref[...],
                     preferred_element_type=jnp.float32)          # canonical NN MXU matmul
    logits = logits + b_ref[...]

    # Row-wise softmax over the (tiny) head axis.
    m = jnp.max(logits, axis=-1, keepdims=True)
    e = jnp.exp(logits - m)
    denom = jnp.sum(e, axis=-1, keepdims=True)
    scores = e / denom                        # true division (torch.round parity at ties)

    if binarize:
        # Straight-through estimator forward value == torch.round(scores).
        # Softmax output lies in [0, 1]; on that interval round-half-to-even is exactly
        # the predicate (s > 0.5): round(0.5) = 0, round(s > 0.5) = 1.
        scores = jnp.where(scores > 0.5, 1.0, 0.0)

    o_ref[...] = scores.astype(o_ref.dtype)


def linear_scorer(inputs, weight, bias, *, binarize_scores=True,
                  target_tile_bytes=4 << 20):
    """inputs: any (B, ...) array; flattened to (B, E) like torch.flatten(1).

    weight: (n_heads, E)  -- torch nn.Linear layout.
    bias  : (n_heads,) or broadcastable.
    Returns (B, n_heads) float32 scores.
    """
    x = inputs.reshape(inputs.shape[0], -1)
    B, E = x.shape
    H = weight.shape[0]

    # Tiny wrapper-side prep (all on (E, H)/(1, H)-sized arrays, negligible traffic):
    w_t = jnp.asarray(weight).astype(x.dtype).T            # (E, H), native MXU dtype
    b_row = jnp.asarray(bias, jnp.float32).reshape(1, H)   # (1, H)

    itemsize = jnp.dtype(x.dtype).itemsize
    row_bytes = E * itemsize

    # Generation-aware VMEM budgets (v7x: 64 MiB, v5e/v6e: 128 MiB).
    vmem_cap = 64 * 1024 * 1024
    try:
        vmem_cap = int(pltpu.get_tpu_info().vmem_capacity_bytes)
    except Exception:
        pass

    # Byte-targeted batch tile: ~target_tile_bytes per activation tile, capped so the
    # double-buffered tile stays inside a fraction of VMEM, the batch, and (for v7x
    # megacore) so that at least 2 grid steps exist when B > 128.
    tile_budget = int(0.40 * vmem_cap)
    max_tb = max(128, (tile_budget // (2 * row_bytes)) // 128 * 128)
    tb = _round_up(max(1, -(-int(target_tile_bytes) // row_bytes)), 128)
    tb = max(128, min(tb, max_tb))
    tb = min(tb, _round_up(B, 128))
    if B > 128:
        tb = min(tb, max(128, _round_up((B + 1) // 2, 128)))

    n_steps = pl.cdiv(B, tb)

    vmem_need = (2 * tb * row_bytes                     # x tile, double-buffered
                 + 2 * E * H * w_t.dtype.itemsize       # weight (resident, 2 bufs)
                 + 2 * H * 4                            # bias
                 + 2 * tb * H * 4                       # output tile, double-buffered
                 + (2 << 20))                           # compiler scratch slack
    vmem_limit = int(min(max(vmem_need, 24 << 20), int(0.72 * vmem_cap)))
    vmem_limit = max(vmem_limit, int(vmem_need))

    return pl.pallas_call(
        functools.partial(_scorer_kernel, binarize=binarize_scores),
        out_shape=jax.ShapeDtypeStruct((B, H), jnp.float32),
        grid=(n_steps,),
        in_specs=[
            pl.BlockSpec((tb, E), lambda i: (i, 0)),    # batch-tiled activations
            pl.BlockSpec((E, H), lambda i: (0, 0)),     # full (tiny) transposed weight
            pl.BlockSpec((1, H), lambda i: (0, 0)),     # bias row
        ],
        out_specs=pl.BlockSpec((tb, H), lambda i: (i, 0)),
        compiler_params=pltpu.CompilerParams(
            dimension_semantics=("parallel",),          # shards batch across v7x's 2 TCs
            vmem_limit_bytes=vmem_limit,
        ),
    )(x, w_t, b_row)


def _reference(inputs, weight, bias, binarize_scores=True):
    x = inputs.reshape(inputs.shape[0], -1).astype(jnp.float32)
    logits = jnp.dot(x, jnp.asarray(weight, jnp.float32).T,
                     precision=jax.lax.Precision.HIGHEST)
    logits = logits + jnp.asarray(bias, jnp.float32).reshape(-1)
    scores = jax.nn.softmax(logits, axis=1)
    if binarize_scores:
        scores = jnp.round(scores)
    return scores


if __name__ == "__main__":
    # BTreeNN default scorer geometry: scorer_size = (emb_in + emb_len) * seq_len = 1032.
    emb_in, emb_len, seq_len = 1, 128, 8
    E = (emb_in + emb_len) * seq_len
    n_heads = 2

    key = jax.random.PRNGKey(0)
    k_x, k_w, k_b, k_x2 = jax.random.split(key, 4)

    # Deterministic Linear params (torch-style uniform(-1/sqrt(fan_in), 1/sqrt(fan_in))).
    bound = 1.0 / (E ** 0.5)
    w = jax.random.uniform(k_w, (n_heads, E), jnp.float32, -bound, bound)
    b = jax.random.uniform(k_b, (n_heads,), jnp.float32, -bound, bound)

    # "inputs_embedded"-style tensor: (B, seq_len, emb_in + emb_len); flatten(1) -> (B, 1032).
    x_small = jax.random.normal(k_x, (8, seq_len, emb_in + emb_len), dtype=jnp.float32)

    # 1) Default forward (binarized scores), tiny batch -> single masked boundary tile.
    out = jax.block_until_ready(linear_scorer(x_small, w, b, binarize_scores=True))
    ref_soft = _reference(x_small, w, b, binarize_scores=False)
    assert out.shape == (8, n_heads), out.shape
    assert bool(jnp.all((out == 0.0) | (out == 1.0)))
    # Compare rounding only where the reference score is safely away from the 0.5 tie.
    safe = jnp.abs(ref_soft - 0.5) > 1e-2
    assert bool(jnp.all(jnp.where(safe, out == jnp.round(ref_soft), True)))

    # 2) Ragged batch -> multi-step grid with a masked boundary block (no wrapper padding).
    x_big = jax.random.normal(k_x2, (300, seq_len, emb_in + emb_len), dtype=jnp.float32)
    out_big = jax.block_until_ready(linear_scorer(x_big, w, b, binarize_scores=False))
    ref_big = _reference(x_big, w, b, binarize_scores=False)
    assert out_big.shape == (300, n_heads), out_big.shape
    assert jnp.allclose(out_big, ref_big, atol=5e-3), float(
        jnp.max(jnp.abs(out_big - ref_big)))

    # 3) bf16 activations/weights fed straight to the MXU (f32 accumulation), no up-cast.
    out_bf16 = jax.block_until_ready(
        linear_scorer(x_small.astype(jnp.bfloat16), w.astype(jnp.bfloat16), b,
                      binarize_scores=False))
    assert float(jnp.max(jnp.abs(out_bf16 - ref_soft))) < 5e-2

    print("KERNEL_OK")
</pallas_src>

<mosaic_0001>
module attributes {stable_mosaic.version = 11 : i64} {
  func.func @_scorer_kernel(%arg0: i32, %arg1: memref<128x1032xf32, #tpu.memory_space<vmem>>, %arg2: memref<1032x2xf32, #tpu.memory_space<vmem>>, %arg3: memref<1x2xf32, #tpu.memory_space<vmem>>, %arg4: memref<128x2xf32, #tpu.memory_space<vmem>>) attributes {dimension_semantics = [#tpu.dimension_semantics<parallel>], iteration_bounds = array<i64: 1>, scalar_prefetch = 0 : i64, scratch_operands = 0 : i64, tpu.core_type = #tpu.core_type<tc>, window_params = [{transform_indices = @transform_0, window_bounds = array<i64: 128, 1032>}, {pipeline_mode = #tpu.pipeline_mode<synchronous>, transform_indices = @transform_1, window_bounds = array<i64: 1032, 2>}, {pipeline_mode = #tpu.pipeline_mode<synchronous>, transform_indices = @transform_2, window_bounds = array<i64: 1, 2>}, {transform_indices = @transform_3, window_bounds = array<i64: 128, 2>}]} {
    %c0 = arith.constant 0 : index
    %c0_0 = arith.constant 0 : index
    %0 = vector.load %arg1[%c0, %c0_0] : memref<128x1032xf32, #tpu.memory_space<vmem>>, vector<128x1032xf32>
    %c0_1 = arith.constant 0 : index
    %c0_2 = arith.constant 0 : index
    %1 = vector.load %arg2[%c0_1, %c0_2] : memref<1032x2xf32, #tpu.memory_space<vmem>>, vector<1032x2xf32>
    %cst = arith.constant dense<0.000000e+00> : vector<128x2xf32>
    %2 = tpu.matmul %0, %1, %cst {dimension_numbers = #tpu.dot_dimension_numbers<[1], [0], [0], [1], [0, 0, 1, 1], [], []>} : vector<128x1032xf32>, vector<1032x2xf32>, vector<128x2xf32> -> vector<128x2xf32>
    %c0_3 = arith.constant 0 : index
    %c0_4 = arith.constant 0 : index
    %3 = vector.load %arg3[%c0_3, %c0_4] : memref<1x2xf32, #tpu.memory_space<vmem>>, vector<1x2xf32>
    %4 = vector.broadcast %3 : vector<1x2xf32> to vector<128x2xf32>
    %5 = arith.addf %2, %4 : vector<128x2xf32>
    %cst_5 = arith.constant dense<0xFF800000> : vector<128xf32>
    %6 = vector.multi_reduction <maximumf>, %5, %cst_5 [1] : vector<128x2xf32> to vector<128xf32>
    %7 = vector.shape_cast %6 : vector<128xf32> to vector<128x1xf32>
    %8 = vector.broadcast %7 : vector<128x1xf32> to vector<128x2xf32>
    %9 = arith.subf %5, %8 : vector<128x2xf32>
    %10 = math.exp %9 : vector<128x2xf32>
    %cst_6 = arith.constant dense<0.000000e+00> : vector<128xf32>
    %11 = vector.multi_reduction <add>, %10, %cst_6 [1] : vector<128x2xf32> to vector<128xf32>
    %12 = vector.shape_cast %11 : vector<128xf32> to vector<128x1xf32>
    %13 = vector.broadcast %12 : vector<128x1xf32> to vector<128x2xf32>
    %14 = arith.divf %10, %13 : vector<128x2xf32>
    %cst_7 = arith.constant 5.000000e-01 : f32
    %15 = vector.broadcast %cst_7 : f32 to vector<128x2xf32>
    %16 = arith.cmpf ogt, %14, %15 : vector<128x2xf32>
    %cst_8 = arith.constant 1.000000e+00 : f32
    %cst_9 = arith.constant 0.000000e+00 : f32
    %17 = vector.broadcast %cst_8 : f32 to vector<128x2xf32>
    %18 = vector.broadcast %cst_9 : f32 to vector<128x2xf32>
    %19 = arith.select %16, %17, %18 : vector<128x2xi1>, vector<128x2xf32>
    %c0_10 = arith.constant 0 : index
    %c0_11 = arith.constant 0 : index
    %20 = vector.load %arg4[%c0_10, %c0_11] : memref<128x2xf32, #tpu.memory_space<vmem>>, vector<128x2xf32>
    tpu.vector_store %arg4[%c0_10, %c0_11], %19 {strides = array<i32>} : memref<128x2xf32, #tpu.memory_space<vmem>>, vector<128x2xf32>,
    return
  }
  func.func @transform_0(%arg0: i32) -> (i32, i32) {
    %c0_i32 = arith.constant 0 : i32
    %c0_i32_0 = arith.constant 0 : i32
    return %arg0, %c0_i32 : i32, i32
  }
  func.func @transform_1(%arg0: i32) -> (i32, i32) {
    %c0_i32 = arith.constant 0 : i32
    %c0_i32_0 = arith.constant 0 : i32
    %c0_i32_1 = arith.constant 0 : i32
    return %c0_i32, %c0_i32_0 : i32, i32
  }
  func.func @transform_2(%arg0: i32) -> (i32, i32) {
    %c0_i32 = arith.constant 0 : i32
    %c0_i32_0 = arith.constant 0 : i32
    %c0_i32_1 = arith.constant 0 : i32
    return %c0_i32, %c0_i32_0 : i32, i32
  }
  func.func @transform_3(%arg0: i32) -> (i32, i32) {
    %c0_i32 = arith.constant 0 : i32
    %c0_i32_0 = arith.constant 0 : i32
    return %arg0, %c0_i32 : i32, i32
  }
}

</mosaic_0001>

<bundles_post_ra>
// kernel: tpu_custom_call.1
= control target key start
LH: loop header
LB: loop body
LE: loop exit
PB: predicated region body
PF: predicated region fallthrough
CT: control target
= control target key end

     0   :  { %vm294_vm0 = vcmask 64512   ;;  %vm1068_vm1 = vcmask 15360   ;;  %s2918_s0 = inlined_call_operand.vmem [shape: f32[8,1032], index: 0, kind: input, shape index: {}]   ;;  %s2919_s1 = inlined_call_operand.vmem [shape: f32[1032,2], index: 1, kind: input, shape index: {}]   ;;  %s2920_s2 = inlined_call_operand.vmem [shape: f32[1,2], index: 2, kind: input, shape index: {}]   ;;  %s2921_s3 = inlined_call_operand.vmem [shape: f32[8,2], index: 3, kind: output, shape index: {}]  }
   0x1   :  { %v189_v0 = vld [vmem:[%s2919_s1 + $0xf8] sm:$0xff]  ;;  %v188_v4 = vld [vmem:[%s2919_s1 + $0xf0] sm:$0xff]  ;;  %v187_v8 = vld [vmem:[%s2919_s1 + $0xe8] sm:$0xff] }
   0x2   :  { %v221_v1 = vld [vmem:[%s2919_s1 + $0x1f8] sm:$0xff]  ;;  %1351 = vmatprep.subr.mxu0 %v189_v0  ;;  %v220_v5 = vld [vmem:[%s2919_s1 + $0x1f0] sm:$0xff]  ;;  %v219_v9 = vld [vmem:[%s2919_s1 + $0x1e8] sm:$0xff] }
   0x3   :  { %v173_v2 = vld [vmem:[%s2919_s1 + $0x78] sm:$0xff]  ;;  %1431 = vmatprep.subr.mxu1 %v221_v1  ;;  %v172_v6 = vld [vmem:[%s2919_s1 + $0x70] sm:$0xff]  ;;  %v171_v10 = vld [vmem:[%s2919_s1 + $0x68] sm:$0xff] }
   0x4   :  { %v205_v3 = vld [vmem:[%s2919_s1 + $0x178] sm:$0xff]  ;;  %1352 = vmatpush3.msra.mxu0 %v173_v2  ;;  %v204_v7 = vld [vmem:[%s2919_s1 + $0x170] sm:$0xff]  ;;  %v203_v11 = vld [vmem:[%s2919_s1 + $0x168] sm:$0xff] }
   0x5   :  { %1432 = vmatpush3.msra.mxu1 %v205_v3  ;;  %1353 = vmatprep.subr.mxu0 %v188_v4  ;;  %v186_v12 = vld [vmem:[%s2919_s1 + $0xe0] sm:$0xff]  ;;  %v185_v16 = vld [vmem:[%s2919_s1 + $0xd8] sm:$0xff]  ;;  %v184_v20 = vld [vmem:[%s2919_s1 + $0xd0] sm:$0xff] }
   0x6   :  { %1433 = vmatprep.subr.mxu1 %v220_v5  ;;  %1354 = vmatpush3.msra.mxu0 %v172_v6  ;;  %v218_v13 = vld [vmem:[%s2919_s1 + $0x1e0] sm:$0xff]  ;;  %v217_v17 = vld [vmem:[%s2919_s1 + $0x1d8] sm:$0xff]  ;;  %v216_v21 = vld [vmem:[%s2919_s1 + $0x1d0] sm:$0xff] }
   0x7   :  { %1434 = vmatpush3.msra.mxu1 %v204_v7  ;;  %1355 = vmatprep.subr.mxu0 %v187_v8  ;;  %v170_v14 = vld [vmem:[%s2919_s1 + $0x60] sm:$0xff]  ;;  %v169_v18 = vld [vmem:[%s2919_s1 + $0x58] sm:$0xff]  ;;  %v168_v22 = vld [vmem:[%s2919_s1 + $0x50] sm:$0xff] }
   0x8   :  { %1435 = vmatprep.subr.mxu1 %v219_v9  ;;  %v202_v15 = vld [vmem:[%s2919_s1 + $0x160] sm:$0xff]  ;;  %1356 = vmatpush3.msra.mxu0 %v171_v10  ;;  %v201_v19 = vld [vmem:[%s2919_s1 + $0x158] sm:$0xff]  ;;  %v200_v23 = vld [vmem:[%s2919_s1 + $0x150] sm:$0xff] }
   0x9   :  { %1436 = vmatpush3.msra.mxu1 %v203_v11  ;;  %1357 = vmatprep.subr.mxu0 %v186_v12  ;;  %v183_v24 = vld [vmem:[%s2919_s1 + $0xc8] sm:$0xff]  ;;  %v182_v28 = vld [vmem:[%s2919_s1 + $0xc0] sm:$0xff]  ;;  %v181_v32 = vld [vmem:[%s2919_s1 + $0xb8] sm:$0xff] }
   0xa   :  { %1437 = vmatprep.subr.mxu1 %v218_v13  ;;  %1358 = vmatpush3.msra.mxu0 %v170_v14  ;;  %v215_v25 = vld [vmem:[%s2919_s1 + $0x1c8] sm:$0xff]  ;;  %v214_v29 = vld [vmem:[%s2919_s1 + $0x1c0] sm:$0xff]  ;;  %v213_v33 = vld [vmem:[%s2919_s1 + $0x1b8] sm:$0xff] }
   0xb   :  { %1438 = vmatpush3.msra.mxu1 %v202_v15  ;;  %1359 = vmatprep.subr.mxu0 %v185_v16  ;;  %v167_v26 = vld [vmem:[%s2919_s1 + $0x48] sm:$0xff]  ;;  %v166_v30 = vld [vmem:[%s2919_s1 + $0x40] sm:$0xff]  ;;  %v165_v34 = vld [vmem:[%s2919_s1 + $0x38] sm:$0xff] }
   0xc   :  { %1439 = vmatprep.subr.mxu1 %v217_v17  ;;  %1360 = vmatpush3.msra.mxu0 %v169_v18  ;;  %v199_v27 = vld [vmem:[%s2919_s1 + $0x148] sm:$0xff]  ;;  %v198_v31 = vld [vmem:[%s2919_s1 + $0x140] sm:$0xff]  ;;  %v197_v35 = vld [vmem:[%s2919_s1 + $0x138] sm:$0xff] }
   0xd   :  { %1440 = vmatpush3.msra.mxu1 %v201_v19  ;;  %1361 = vmatprep.subr.mxu0 %v184_v20  ;;  %v180_v36 = vld [vmem:[%s2919_s1 + $0xb0] sm:$0xff]  ;;  %v179_v40 = vld [vmem:[%s2919_s1 + $0xa8] sm:$0xff]  ;;  %v178_v44 = vld [vmem:[%s2919_s1 + $0xa0] sm:$0xff] }
   0xe   :  { %1441 = vmatprep.subr.mxu1 %v216_v21  ;;  %1362 = vmatpush3.msra.mxu0 %v168_v22  ;;  %v212_v37 = vld [vmem:[%s2919_s1 + $0x1b0] sm:$0xff]  ;;  %v211_v41 = vld [vmem:[%s2919_s1 + $0x1a8] sm:$0xff]  ;;  %v210_v45 = vld [vmem:[%s2919_s1 + $0x1a0] sm:$0xff] }
   0xf   :  { %1442 = vmatpush3.msra.mxu1 %v200_v23  ;;  %1363 = vmatprep.subr.mxu0 %v183_v24  ;;  %v164_v38 = vld [vmem:[%s2919_s1 + $0x30] sm:$0xff]  ;;  %v163_v42 = vld [vmem:[%s2919_s1 + $0x28] sm:$0xff]  ;;  %v162_v46 = vld [vmem:[%s2919_s1 + $0x20] sm:$0xff] }
  0x10   :  { %1443 = vmatprep.subr.mxu1 %v215_v25  ;;  %1364 = vmatpush3.msra.mxu0 %v167_v26  ;;  %v196_v39 = vld [vmem:[%s2919_s1 + $0x130] sm:$0xff]  ;;  %v195_v43 = vld [vmem:[%s2919_s1 + $0x128] sm:$0xff]  ;;  %v194_v47 = vld [vmem:[%s2919_s1 + $0x120] sm:$0xff] }
  0x11   :  { %1444 = vmatpush3.msra.mxu1 %v199_v27  ;;  %1365 = vmatprep.subr.mxu0 %v182_v28  ;;  %v177_v48 = vld [vmem:[%s2919_s1 + $0x98] sm:$0xff]  ;;  %v176_v52 = vld [vmem:[%s2919_s1 + $0x90] sm:$0xff]  ;;  %v175_v56 = vld [vmem:[%s2919_s1 + $0x88] sm:$0xff] }
  0x12   :  { %1445 = vmatprep.subr.mxu1 %v214_v29  ;;  %1366 = vmatpush3.msra.mxu0 %v166_v30  ;;  %v209_v49 = vld [vmem:[%s2919_s1 + $0x198] sm:$0xff]  ;;  %v208_v53 = vld [vmem:[%s2919_s1 + $0x190] sm:$0xff]  ;;  %v207_v57 = vld [vmem:[%s2919_s1 + $0x188] sm:$0xff] }
  0x13   :  { %1446 = vmatpush3.msra.mxu1 %v198_v31  ;;  %1367 = vmatprep.subr.mxu0 %v181_v32  ;;  %v161_v50 = vld [vmem:[%s2919_s1 + $0x18] sm:$0xff]  ;;  %v160_v54 = vld [vmem:[%s2919_s1 + $0x10] sm:$0xff]  ;;  %v159_v58 = vld [vmem:[%s2919_s1 + $0x8] sm:$0xff] }
  0x14   :  { %1447 = vmatprep.subr.mxu1 %v213_v33  ;;  %1368 = vmatpush3.msra.mxu0 %v165_v34  ;;  %v193_v51 = vld [vmem:[%s2919_s1 + $0x118] sm:$0xff]  ;;  %v192_v55 = vld [vmem:[%s2919_s1 + $0x110] sm:$0xff]  ;;  %v191_v59 = vld [vmem:[%s2919_s1 + $0x108] sm:$0xff] }
  0x15   :  { %1448 = vmatpush3.msra.mxu1 %v197_v35  ;;  %1369 = vmatprep.subr.mxu0 %v180_v36  ;;  %v174_v60 = vld [vmem:[%s2919_s1 + $0x80] sm:$0xff]  ;;  %v15_v63 = vld [vmem:[%s2918_s0 + $0x8] sm:$0xff]  ;;  %v17_v1 = vld [vmem:[%s2918_s0 + $0x18] sm:$0xff] }
  0x16   :  { %1449 = vmatprep.subr.mxu1 %v212_v37  ;;  %1370 = vmatpush3.msra.mxu0 %v164_v38  ;;  %v206_v61 = vld [vmem:[%s2919_s1 + $0x180] sm:$0xff]  ;;  %v16_v3 = vld [vmem:[%s2918_s0 + $0x10] sm:$0xff]  ;;  %v253_v4 = vld [vmem:[%s2919_s1 + $0x2f8] sm:$0xff] }
  0x17   :  { %1450 = vmatpush3.msra.mxu1 %v196_v39  ;;  %1371 = vmatprep.subr.mxu0 %v179_v40  ;;  %v158_v62 = vld [vmem:[%s2919_s1] sm:$0xff]  ;;  %v285_v5 = vld [vmem:[%s2919_s1 + $0x3f8] sm:$0xff]  ;;  %v24_v8 = vld [vmem:[%s2918_s0 + $0x50] sm:$0xff] }
  0x18   :  { %1451 = vmatprep.subr.mxu1 %v211_v41  ;;  %1372 = vmatpush3.msra.mxu0 %v163_v42  ;;  %v190_v0 = vld [vmem:[%s2919_s1 + $0x100] sm:$0xff]  ;;  %v237_v6 = vld [vmem:[%s2919_s1 + $0x278] sm:$0xff]  ;;  %v23_v10 = vld [vmem:[%s2918_s0 + $0x48] sm:$0xff] }
  0x19   :  { %1452 = vmatpush3.msra.mxu1 %v195_v43  ;;  %1373 = vmatprep.subr.mxu0 %v178_v44  ;;  %v14_v2 = vld [vmem:[%s2918_s0] sm:$0xff]  ;;  %v269_v7 = vld [vmem:[%s2919_s1 + $0x378] sm:$0xff]  ;;  %v252_v12 = vld [vmem:[%s2919_s1 + $0x2f0] sm:$0xff] }
  0x1a   :  { %1453 = vmatprep.subr.mxu1 %v210_v45  ;;  %1374 = vmatpush3.msra.mxu0 %v162_v46  ;;  %v26_v9 = vld [vmem:[%s2918_s0 + $0x60] sm:$0xff]  ;;  %v25_v11 = vld [vmem:[%s2918_s0 + $0x58] sm:$0xff]  ;;  %v284_v13 = vld [vmem:[%s2919_s1 + $0x3f0] sm:$0xff] }
  0x1b   :  { %1454 = vmatpush3.msra.mxu1 %v194_v47  ;;  %1375 = vmatprep.subr.mxu0 %v177_v48  ;;  %v236_v14 = vld [vmem:[%s2919_s1 + $0x270] sm:$0xff]  ;;  %v33_v16 = vld [vmem:[%s2918_s0 + $0x98] sm:$0xff]  ;;  %v35_v17 = vld [vmem:[%s2918_s0 + $0xa8] sm:$0xff] }
  0x1c   :  { %1455 = vmatprep.subr.mxu1 %v209_v49  ;;  %1376 = vmatpush3.msra.mxu0 %v161_v50  ;;  %v268_v15 = vld [vmem:[%s2919_s1 + $0x370] sm:$0xff]  ;;  %v34_v19 = vld [vmem:[%s2918_s0 + $0xa0] sm:$0xff]  ;;  %v251_v20 = vld [vmem:[%s2919_s1 + $0x2e8] sm:$0xff] }
  0x1d   :  { %1456 = vmatpush3.msra.mxu1 %v193_v51  ;;  %1377 = vmatprep.subr.mxu0 %v176_v52  ;;  %v32_v18 = vld [vmem:[%s2918_s0 + $0x90] sm:$0xff]  ;;  %v283_v21 = vld [vmem:[%s2919_s1 + $0x3e8] sm:$0xff]  ;;  %v42_v24 = vld [vmem:[%s2918_s0 + $0xe0] sm:$0xff] }
  0x1e   :  { %1457 = vmatprep.subr.mxu1 %v208_v53  ;;  %1378 = vmatpush3.msra.mxu0 %v160_v54  ;;  %v235_v22 = vld [vmem:[%s2919_s1 + $0x268] sm:$0xff]  ;;  %v44_v25 = vld [vmem:[%s2918_s0 + $0xf0] sm:$0xff]  ;;  %v41_v26 = vld [vmem:[%s2918_s0 + $0xd8] sm:$0xff] }
  0x1f   :  { %1458 = vmatpush3.msra.mxu1 %v192_v55  ;;  %1379 = vmatprep.subr.mxu0 %v175_v56  ;;  %v267_v23 = vld [vmem:[%s2919_s1 + $0x368] sm:$0xff]  ;;  %v250_v28 = vld [vmem:[%s2919_s1 + $0x2e0] sm:$0xff]  ;;  %v53_v33 = vld [vmem:[%s2918_s0 + $0x138] sm:$0xff] }
  0x20   :  { %1459 = vmatprep.subr.mxu1 %v207_v57  ;;  %1380 = vmatpush3.msra.mxu0 %v159_v58  ;;  %v43_v27 = vld [vmem:[%s2918_s0 + $0xe8] sm:$0xff]  ;;  %v282_v29 = vld [vmem:[%s2919_s1 + $0x3e0] sm:$0xff]  ;;  %v52_v35 = vld [vmem:[%s2918_s0 + $0x130] sm:$0xff] }
  0x21   :  { %1460 = vmatpush3.msra.mxu1 %v191_v59  ;;  %1381 = vmatprep.subr.mxu0 %v174_v60  ;;  %v234_v30 = vld [vmem:[%s2919_s1 + $0x260] sm:$0xff]  ;;  %v51_v32 = vld [vmem:[%s2918_s0 + $0x128] sm:$0xff]  ;;  %v249_v36 = vld [vmem:[%s2919_s1 + $0x2d8] sm:$0xff] }
  0x22   :  { %1461 = vmatprep.subr.mxu1 %v206_v61  ;;  %1382 = vmatpush3.msra.mxu0 %v158_v62  ;;  %v266_v31 = vld [vmem:[%s2919_s1 + $0x360] sm:$0xff]  ;;  %v281_v37 = vld [vmem:[%s2919_s1 + $0x3d8] sm:$0xff]  ;;  %v60_v40 = vld [vmem:[%s2918_s0 + $0x170] sm:$0xff] }
  0x23   :  { %407 = vmatprep.mubr.f32.mxu0 %v15_v63  ;;  %1462 = vmatpush3.msra.mxu1 %v190_v0  ;;  %v50_v34 = vld [vmem:[%s2918_s0 + $0x120] sm:$0xff]  ;;  %v233_v38 = vld [vmem:[%s2919_s1 + $0x258] sm:$0xff]  ;;  %v59_v42 = vld [vmem:[%s2918_s0 + $0x168] sm:$0xff] }
  0x24   :  { %552 = vmatprep.mubr.f32.mxu1 %v17_v1  ;;  %408 = vmatmul.mubr.f32.vlgmr.msra.gmra.mxu0 %v14_v2  ;;  %v265_v39 = vld [vmem:[%s2919_s1 + $0x358] sm:$0xff]  ;;  %v62_v41 = vld [vmem:[%s2918_s0 + $0x180] sm:$0xff]  ;;  %v248_v44 = vld [vmem:[%s2919_s1 + $0x2d0] sm:$0xff] }
  0x25   :  { %553 = vmatmul.mubr.f32.vlgmr.msra.gmra.mxu1 %v16_v3  ;;  %1511 = vmatprep.subr.mxu0 %v253_v4  ;;  %v61_v43 = vld [vmem:[%s2918_s0 + $0x178] sm:$0xff]  ;;  %v280_v45 = vld [vmem:[%s2919_s1 + $0x3d0] sm:$0xff]  ;;  %v71_v49 = vld [vmem:[%s2918_s0 + $0x1c8] sm:$0xff] }
  0x26   :  { %1591 = vmatprep.subr.mxu1 %v285_v5  ;;  %1512 = vmatpush3.msra.mxu0 %v237_v6  ;;  %v232_v46 = vld [vmem:[%s2919_s1 + $0x250] sm:$0xff]  ;;  %v69_v48 = vld [vmem:[%s2918_s0 + $0x1b8] sm:$0xff]  ;;  %v70_v51 = vld [vmem:[%s2918_s0 + $0x1c0] sm:$0xff] }
  0x27   :  { %1592 = vmatpush3.msra.mxu1 %v269_v7  ;;  %412 = vmatprep.mubr.f32.mxu0 %v24_v8  ;;  %v264_v47 = vld [vmem:[%s2919_s1 + $0x350] sm:$0xff]  ;;  %v247_v52 = vld [vmem:[%s2919_s1 + $0x2c8] sm:$0xff]  ;;  %v78_v56 = vld [vmem:[%s2918_s0 + $0x200] sm:$0xff] }
  0x28   :  { %557 = vmatprep.mubr.f32.mxu1 %v26_v9  ;;  %413 = vmatmul.mubr.f32.gmra.mxu0 %v23_v10  ;;  %v68_v50 = vld [vmem:[%s2918_s0 + $0x1b0] sm:$0xff]  ;;  %v279_v53 = vld [vmem:[%s2919_s1 + $0x3c8] sm:$0xff]  ;;  %v77_v58 = vld [vmem:[%s2918_s0 + $0x1f8] sm:$0xff] }
  0x29   :  { %558 = vmatmul.mubr.f32.gmra.mxu1 %v25_v11  ;;  %1513 = vmatprep.subr.mxu0 %v252_v12  ;;  %v231_v54 = vld [vmem:[%s2919_s1 + $0x248] sm:$0xff]  ;;  %v80_v57 = vld [vmem:[%s2918_s0 + $0x210] sm:$0xff]  ;;  %v246_v60 = vld [vmem:[%s2919_s1 + $0x2c0] sm:$0xff] }
  0x2a   :  { %1593 = vmatprep.subr.mxu1 %v284_v13  ;;  %1514 = vmatpush3.msra.mxu0 %v236_v14  ;;  %v263_v55 = vld [vmem:[%s2919_s1 + $0x348] sm:$0xff]  ;;  %v278_v61 = vld [vmem:[%s2919_s1 + $0x3c0] sm:$0xff]  ;;  %v89_v1 = vld [vmem:[%s2918_s0 + $0x258] sm:$0xff] }
  0x2b   :  { %1594 = vmatpush3.msra.mxu1 %v268_v15  ;;  %417 = vmatprep.mubr.f32.mxu0 %v33_v16  ;;  %v79_v59 = vld [vmem:[%s2918_s0 + $0x208] sm:$0xff]  ;;  %v230_v62 = vld [vmem:[%s2919_s1 + $0x240] sm:$0xff]  ;;  %v88_v3 = vld [vmem:[%s2918_s0 + $0x250] sm:$0xff] }
  0x2c   :  { %562 = vmatprep.mubr.f32.mxu1 %v35_v17  ;;  %418 = vmatmul.mubr.f32.gmra.mxu0 %v32_v18  ;;  %v262_v63 = vld [vmem:[%s2919_s1 + $0x340] sm:$0xff]  ;;  %v87_v0 = vld [vmem:[%s2918_s0 + $0x248] sm:$0xff]  ;;  %v245_v4 = vld [vmem:[%s2919_s1 + $0x2b8] sm:$0xff] }
  0x2d   :  { %563 = vmatmul.mubr.f32.gmra.mxu1 %v34_v19  ;;  %1515 = vmatprep.subr.mxu0 %v251_v20  ;;  %v86_v2 = vld [vmem:[%s2918_s0 + $0x240] sm:$0xff]  ;;  %v277_v5 = vld [vmem:[%s2919_s1 + $0x3b8] sm:$0xff]  ;;  %v96_v8 = vld [vmem:[%s2918_s0 + $0x290] sm:$0xff] }
  0x2e   :  { %1595 = vmatprep.subr.mxu1 %v283_v21  ;;  %1516 = vmatpush3.msra.mxu0 %v235_v22  ;;  %v229_v6 = vld [vmem:[%s2919_s1 + $0x238] sm:$0xff]  ;;  %v98_v9 = vld [vmem:[%s2918_s0 + $0x2a0] sm:$0xff]  ;;  %v95_v10 = vld [vmem:[%s2918_s0 + $0x288] sm:$0xff] }
  0x2f   :  { %1596 = vmatpush3.msra.mxu1 %v267_v23  ;;  %422 = vmatprep.mubr.f32.mxu0 %v42_v24  ;;  %v261_v7 = vld [vmem:[%s2919_s1 + $0x338] sm:$0xff]  ;;  %v244_v12 = vld [vmem:[%s2919_s1 + $0x2b0] sm:$0xff]  ;;  %v107_v17 = vld [vmem:[%s2918_s0 + $0x2e8] sm:$0xff] }
  0x30   :  { %567 = vmatprep.mubr.f32.mxu1 %v44_v25  ;;  %423 = vmatmul.mubr.f32.gmra.mxu0 %v41_v26  ;;  %v97_v11 = vld [vmem:[%s2918_s0 + $0x298] sm:$0xff]  ;;  %v276_v13 = vld [vmem:[%s2919_s1 + $0x3b0] sm:$0xff]  ;;  %v106_v19 = vld [vmem:[%s2918_s0 + $0x2e0] sm:$0xff] }
  0x31   :  { %568 = vmatmul.mubr.f32.gmra.mxu1 %v43_v27  ;;  %1517 = vmatprep.subr.mxu0 %v250_v28  ;;  %v228_v14 = vld [vmem:[%s2919_s1 + $0x230] sm:$0xff]  ;;  %v105_v16 = vld [vmem:[%s2918_s0 + $0x2d8] sm:$0xff]  ;;  %v243_v20 = vld [vmem:[%s2919_s1 + $0x2a8] sm:$0xff] }
  0x32   :  { %1597 = vmatprep.subr.mxu1 %v282_v29  ;;  %1518 = vmatpush3.msra.mxu0 %v234_v30  ;;  %v260_v15 = vld [vmem:[%s2919_s1 + $0x330] sm:$0xff]  ;;  %v275_v21 = vld [vmem:[%s2919_s1 + $0x3a8] sm:$0xff]  ;;  %v114_v24 = vld [vmem:[%s2918_s0 + $0x320] sm:$0xff] }
  0x33   :  { %1598 = vmatpush3.msra.mxu1 %v266_v31  ;;  %427 = vmatprep.mubr.f32.mxu0 %v51_v32  ;;  %v104_v18 = vld [vmem:[%s2918_s0 + $0x2d0] sm:$0xff]  ;;  %v227_v22 = vld [vmem:[%s2919_s1 + $0x228] sm:$0xff]  ;;  %v113_v26 = vld [vmem:[%s2918_s0 + $0x318] sm:$0xff] }
  0x34   :  { %572 = vmatprep.mubr.f32.mxu1 %v53_v33  ;;  %428 = vmatmul.mubr.f32.gmra.mxu0 %v50_v34  ;;  %v259_v23 = vld [vmem:[%s2919_s1 + $0x328] sm:$0xff]  ;;  %v116_v25 = vld [vmem:[%s2918_s0 + $0x330] sm:$0xff]  ;;  %v242_v28 = vld [vmem:[%s2919_s1 + $0x2a0] sm:$0xff] }
  0x35   :  { %573 = vmatmul.mubr.f32.gmra.mxu1 %v52_v35  ;;  %1519 = vmatprep.subr.mxu0 %v249_v36  ;;  %v115_v27 = vld [vmem:[%s2918_s0 + $0x328] sm:$0xff]  ;;  %v274_v29 = vld [vmem:[%s2919_s1 + $0x3a0] sm:$0xff]  ;;  %v125_v33 = vld [vmem:[%s2918_s0 + $0x378] sm:$0xff] }
  0x36   :  { %1599 = vmatprep.subr.mxu1 %v281_v37  ;;  %1520 = vmatpush3.msra.mxu0 %v233_v38  ;;  %v226_v30 = vld [vmem:[%s2919_s1 + $0x220] sm:$0xff]  ;;  %v123_v32 = vld [vmem:[%s2918_s0 + $0x368] sm:$0xff]  ;;  %v124_v35 = vld [vmem:[%s2918_s0 + $0x370] sm:$0xff] }
  0x37   :  { %1600 = vmatpush3.msra.mxu1 %v265_v39  ;;  %432 = vmatprep.mubr.f32.mxu0 %v60_v40  ;;  %v258_v31 = vld [vmem:[%s2919_s1 + $0x320] sm:$0xff]  ;;  %v241_v36 = vld [vmem:[%s2919_s1 + $0x298] sm:$0xff]  ;;  %v132_v40 = vld [vmem:[%s2918_s0 + $0x3b0] sm:$0xff] }
  0x38   :  { %577 = vmatprep.mubr.f32.mxu1 %v62_v41  ;;  %433 = vmatmul.mubr.f32.gmra.mxu0 %v59_v42  ;;  %v122_v34 = vld [vmem:[%s2918_s0 + $0x360] sm:$0xff]  ;;  %v273_v37 = vld [vmem:[%s2919_s1 + $0x398] sm:$0xff]  ;;  %v131_v42 = vld [vmem:[%s2918_s0 + $0x3a8] sm:$0xff] }
  0x39   :  { %578 = vmatmul.mubr.f32.gmra.mxu1 %v61_v43  ;;  %1521 = vmatprep.subr.mxu0 %v248_v44  ;;  %v225_v38 = vld [vmem:[%s2919_s1 + $0x218] sm:$0xff]  ;;  %v134_v41 = vld [vmem:[%s2918_s0 + $0x3c0] sm:$0xff]  ;;  %v240_v44 = vld [vmem:[%s2919_s1 + $0x290] sm:$0xff] }
  0x3a   :  { %1601 = vmatprep.subr.mxu1 %v280_v45  ;;  %1522 = vmatpush3.msra.mxu0 %v232_v46  ;;  %v257_v39 = vld [vmem:[%s2919_s1 + $0x318] sm:$0xff]  ;;  %v272_v45 = vld [vmem:[%s2919_s1 + $0x390] sm:$0xff] }
  0x3b   :  { %1602 = vmatpush3.msra.mxu1 %v264_v47  ;;  %437 = vmatprep.mubr.f32.mxu0 %v69_v48  ;;  %v133_v43 = vld [vmem:[%s2918_s0 + $0x3b8] sm:$0xff]  ;;  %v224_v46 = vld [vmem:[%s2919_s1 + $0x210] sm:$0xff] }
  0x3c   :  { %582 = vmatprep.mubr.f32.mxu1 %v71_v49  ;;  %438 = vmatmul.mubr.f32.gmra.mxu0 %v68_v50  ;;  %v256_v47 = vld [vmem:[%s2919_s1 + $0x310] sm:$0xff]  ;;  %v141_v48 = vld [vmem:[%s2918_s0 + $0x3f8] sm:$0xff]  ;;  %v143_v49 = vld [vmem:[%s2918_s0 + $0x408] sm:$0xff] }
  0x3d   :  { %583 = vmatmul.mubr.f32.gmra.mxu1 %v70_v51  ;;  %1523 = vmatprep.subr.mxu0 %v247_v52  ;;  %v140_v50 = vld [vmem:[%s2918_s0 + $0x3f0] sm:$0xff]  ;;  %v142_v51 = vld [vmem:[%s2918_s0 + $0x400] sm:$0xff]  ;;  %v239_v52 = vld [vmem:[%s2919_s1 + $0x288] sm:$0xff] }
  0x3e   :  { %1603 = vmatprep.subr.mxu1 %v279_v53  ;;  %1524 = vmatpush3.msra.mxu0 %v231_v54  ;;  %v271_v53 = vld [vmem:[%s2919_s1 + $0x388] sm:$0xff] }
  0x3f   :  { %1604 = vmatpush3.msra.mxu1 %v263_v55  ;;  %442 = vmatprep.mubr.f32.mxu0 %v78_v56  ;;  %v223_v54 = vld [vmem:[%s2919_s1 + $0x208] sm:$0xff]  ;;  %v150_v56 = vld [vmem:[%s2918_s0 + $0x440] sm:$0xff] }
  0x40   :  { %587 = vmatprep.mubr.f32.mxu1 %v80_v57  ;;  %443 = vmatmul.mubr.f32.gmra.mxu0 %v77_v58  ;;  %v255_v55 = vld [vmem:[%s2919_s1 + $0x308] sm:$0xff]  ;;  %v152_v57 = vld [vmem:[%s2918_s0 + $0x450] sm:$0xff]  ;;  %v149_v58 = vld [vmem:[%s2918_s0 + $0x438] sm:$0xff] }
  0x41   :  { %588 = vmatmul.mubr.f32.gmra.mxu1 %v79_v59  ;;  %1525 = vmatprep.subr.mxu0 %v246_v60  ;;  %v151_v59 = vld [vmem:[%s2918_s0 + $0x448] sm:$0xff]  ;;  %v238_v60 = vld [vmem:[%s2919_s1 + $0x280] sm:$0xff] }
  0x42   :  { %1605 = vmatprep.subr.mxu1 %v278_v61  ;;  %1526 = vmatpush3.msra.mxu0 %v230_v62  ;;  %v270_v61 = vld [vmem:[%s2919_s1 + $0x380] sm:$0xff] }
  0x43   :  { %1606 = vmatpush3.msra.mxu1 %v262_v63  ;;  %447 = vmatprep.mubr.f32.mxu0 %v87_v0  ;;  %v222_v62 = vld [vmem:[%s2919_s1 + $0x200] sm:$0xff]  ;;  %v19_v0 = vld [vmem:[%s2918_s0 + $0x28] sm:$0xff] }
  0x44   :  { %592 = vmatprep.mubr.f32.mxu1 %v89_v1  ;;  %448 = vmatmul.mubr.f32.gmra.mxu0 %v86_v2  ;;  %v254_v63 = vld [vmem:[%s2919_s1 + $0x300] sm:$0xff]  ;;  %v21_v1 = vld [vmem:[%s2918_s0 + $0x38] sm:$0xff] }
  0x45   :  { %593 = vmatmul.mubr.f32.gmra.mxu1 %v88_v3  ;;  %1527 = vmatprep.subr.mxu0 %v245_v4  ;;  %v18_v2 = vld [vmem:[%s2918_s0 + $0x20] sm:$0xff]  ;;  %v20_v3 = vld [vmem:[%s2918_s0 + $0x30] sm:$0xff] }
  0x46   :  { %1607 = vmatprep.subr.mxu1 %v277_v5  ;;  %1528 = vmatpush3.msra.mxu0 %v229_v6  ;;  %v286_v4 = vld [vmem:[%s2919_s1 + $0x400] sm:$0xff]  ;;  %v28_v5 = vld [vmem:[%s2918_s0 + $0x70] sm:$0xff] }
  0x47   :  { %1608 = vmatpush3.msra.mxu1 %v261_v7  ;;  %452 = vmatprep.mubr.f32.mxu0 %v96_v8  ;;  %v30_v6 = vld [vmem:[%s2918_s0 + $0x80] sm:$0xff]  ;;  %v27_v7 = vld [vmem:[%s2918_s0 + $0x68] sm:$0xff]  ;;  %v29_v8 = vld [vmem:[%s2918_s0 + $0x78] sm:$0xff] }
  0x48   :  { %597 = vmatprep.mubr.f32.mxu1 %v98_v9  ;;  %453 = vmatmul.mubr.f32.gmra.mxu0 %v95_v10  ;;  %v37_v9 = vld [vmem:[%s2918_s0 + $0xb8] sm:$0xff]  ;;  %v39_v10 = vld [vmem:[%s2918_s0 + $0xc8] sm:$0xff] }
  0x49   :  { %598 = vmatmul.mubr.f32.gmra.mxu1 %v97_v11  ;;  %1529 = vmatprep.subr.mxu0 %v244_v12  ;;  %v36_v11 = vld [vmem:[%s2918_s0 + $0xb0] sm:$0xff]  ;;  %v38_v12 = vld [vmem:[%s2918_s0 + $0xc0] sm:$0xff] }
  0x4a   :  { %1609 = vmatprep.subr.mxu1 %v276_v13  ;;  %1530 = vmatpush3.msra.mxu0 %v228_v14  ;;  %v46_v13 = vld [vmem:[%s2918_s0 + $0x100] sm:$0xff]  ;;  %v48_v14 = vld [vmem:[%s2918_s0 + $0x110] sm:$0xff] }
  0x4b   :  { %1610 = vmatpush3.msra.mxu1 %v260_v15  ;;  %457 = vmatprep.mubr.f32.mxu0 %v105_v16  ;;  %v45_v15 = vld [vmem:[%s2918_s0 + $0xf8] sm:$0xff]  ;;  %v47_v16 = vld [vmem:[%s2918_s0 + $0x108] sm:$0xff] }
  0x4c   :  { %602 = vmatprep.mubr.f32.mxu1 %v107_v17  ;;  %458 = vmatmul.mubr.f32.gmra.mxu0 %v104_v18  ;;  %v55_v17 = vld [vmem:[%s2918_s0 + $0x148] sm:$0xff]  ;;  %v57_v18 = vld [vmem:[%s2918_s0 + $0x158] sm:$0xff] }
  0x4d   :  { %603 = vmatmul.mubr.f32.gmra.mxu1 %v106_v19  ;;  %1531 = vmatprep.subr.mxu0 %v243_v20  ;;  %v54_v19 = vld [vmem:[%s2918_s0 + $0x140] sm:$0xff]  ;;  %v56_v20 = vld [vmem:[%s2918_s0 + $0x150] sm:$0xff] }
  0x4e   :  { %1611 = vmatprep.subr.mxu1 %v275_v21  ;;  %1532 = vmatpush3.msra.mxu0 %v227_v22  ;;  %v64_v21 = vld [vmem:[%s2918_s0 + $0x190] sm:$0xff]  ;;  %v66_v22 = vld [vmem:[%s2918_s0 + $0x1a0] sm:$0xff] }
  0x4f   :  { %1612 = vmatpush3.msra.mxu1 %v259_v23  ;;  %462 = vmatprep.mubr.f32.mxu0 %v114_v24  ;;  %v63_v23 = vld [vmem:[%s2918_s0 + $0x188] sm:$0xff]  ;;  %v65_v24 = vld [vmem:[%s2918_s0 + $0x198] sm:$0xff] }
  0x50   :  { %607 = vmatprep.mubr.f32.mxu1 %v116_v25  ;;  %463 = vmatmul.mubr.f32.gmra.mxu0 %v113_v26  ;;  %v73_v25 = vld [vmem:[%s2918_s0 + $0x1d8] sm:$0xff]  ;;  %v75_v26 = vld [vmem:[%s2918_s0 + $0x1e8] sm:$0xff] }
  0x51   :  { %608 = vmatmul.mubr.f32.gmra.mxu1 %v115_v27  ;;  %1533 = vmatprep.subr.mxu0 %v242_v28  ;;  %v72_v27 = vld [vmem:[%s2918_s0 + $0x1d0] sm:$0xff]  ;;  %v74_v28 = vld [vmem:[%s2918_s0 + $0x1e0] sm:$0xff] }
  0x52   :  { %1613 = vmatprep.subr.mxu1 %v274_v29  ;;  %1534 = vmatpush3.msra.mxu0 %v226_v30  ;;  %v82_v29 = vld [vmem:[%s2918_s0 + $0x220] sm:$0xff]  ;;  %v84_v30 = vld [vmem:[%s2918_s0 + $0x230] sm:$0xff] }
  0x53   :  { %1614 = vmatpush3.msra.mxu1 %v258_v31  ;;  %467 = vmatprep.mubr.f32.mxu0 %v123_v32  ;;  %v81_v31 = vld [vmem:[%s2918_s0 + $0x218] sm:$0xff]  ;;  %v83_v32 = vld [vmem:[%s2918_s0 + $0x228] sm:$0xff] }
  0x54   :  { %612 = vmatprep.mubr.f32.mxu1 %v125_v33  ;;  %468 = vmatmul.mubr.f32.gmra.mxu0 %v122_v34  ;;  %v91_v33 = vld [vmem:[%s2918_s0 + $0x268] sm:$0xff]  ;;  %v93_v34 = vld [vmem:[%s2918_s0 + $0x278] sm:$0xff] }
  0x55   :  { %613 = vmatmul.mubr.f32.gmra.mxu1 %v124_v35  ;;  %1535 = vmatprep.subr.mxu0 %v241_v36  ;;  %v90_v35 = vld [vmem:[%s2918_s0 + $0x260] sm:$0xff]  ;;  %v92_v36 = vld [vmem:[%s2918_s0 + $0x270] sm:$0xff] }
  0x56   :  { %1615 = vmatprep.subr.mxu1 %v273_v37  ;;  %1536 = vmatpush3.msra.mxu0 %v225_v38  ;;  %v100_v37 = vld [vmem:[%s2918_s0 + $0x2b0] sm:$0xff]  ;;  %v102_v38 = vld [vmem:[%s2918_s0 + $0x2c0] sm:$0xff] }
  0x57   :  { %1616 = vmatpush3.msra.mxu1 %v257_v39  ;;  %472 = vmatprep.mubr.f32.mxu0 %v132_v40  ;;  %v99_v39 = vld [vmem:[%s2918_s0 + $0x2a8] sm:$0xff]  ;;  %v101_v40 = vld [vmem:[%s2918_s0 + $0x2b8] sm:$0xff] }
  0x58   :  { %617 = vmatprep.mubr.f32.mxu1 %v134_v41  ;;  %473 = vmatmul.mubr.f32.gmra.mxu0 %v131_v42  ;;  %v109_v41 = vld [vmem:[%s2918_s0 + $0x2f8] sm:$0xff]  ;;  %v111_v42 = vld [vmem:[%s2918_s0 + $0x308] sm:$0xff] }
  0x59   :  { %618 = vmatmul.mubr.f32.gmra.mxu1 %v133_v43  ;;  %1537 = vmatprep.subr.mxu0 %v240_v44  ;;  %v108_v43 = vld [vmem:[%s2918_s0 + $0x2f0] sm:$0xff]  ;;  %v110_v44 = vld [vmem:[%s2918_s0 + $0x300] sm:$0xff] }
  0x5a   :  { %1617 = vmatprep.subr.mxu1 %v272_v45  ;;  %1538 = vmatpush3.msra.mxu0 %v224_v46  ;;  %v118_v45 = vld [vmem:[%s2918_s0 + $0x340] sm:$0xff]  ;;  %v120_v46 = vld [vmem:[%s2918_s0 + $0x350] sm:$0xff] }
  0x5b   :  { %1618 = vmatpush3.msra.mxu1 %v256_v47  ;;  %477 = vmatprep.mubr.f32.mxu0 %v141_v48  ;;  %v117_v47 = vld [vmem:[%s2918_s0 + $0x338] sm:$0xff]  ;;  %v119_v48 = vld [vmem:[%s2918_s0 + $0x348] sm:$0xff] }
  0x5c   :  { %622 = vmatprep.mubr.f32.mxu1 %v143_v49  ;;  %478 = vmatmul.mubr.f32.gmra.mxu0 %v140_v50  ;;  %v127_v49 = vld [vmem:[%s2918_s0 + $0x388] sm:$0xff]  ;;  %v129_v50 = vld [vmem:[%s2918_s0 + $0x398] sm:$0xff] }
  0x5d   :  { %623 = vmatmul.mubr.f32.gmra.mxu1 %v142_v51  ;;  %1539 = vmatprep.subr.mxu0 %v239_v52  ;;  %v126_v51 = vld [vmem:[%s2918_s0 + $0x380] sm:$0xff]  ;;  %v128_v52 = vld [vmem:[%s2918_s0 + $0x390] sm:$0xff] }
  0x5e   :  { %1619 = vmatprep.subr.mxu1 %v271_v53  ;;  %1540 = vmatpush3.msra.mxu0 %v223_v54  ;;  %v136_v53 = vld [vmem:[%s2918_s0 + $0x3d0] sm:$0xff]  ;;  %v138_v54 = vld [vmem:[%s2918_s0 + $0x3e0] sm:$0xff] }
  0x5f   :  { %1620 = vmatpush3.msra.mxu1 %v255_v55  ;;  %482 = vmatprep.mubr.f32.mxu0 %v150_v56  ;;  %v135_v55 = vld [vmem:[%s2918_s0 + $0x3c8] sm:$0xff]  ;;  %v137_v56 = vld [vmem:[%s2918_s0 + $0x3d8] sm:$0xff] }
  0x60   :  { %627 = vmatprep.mubr.f32.mxu1 %v152_v57  ;;  %483 = vmatmul.mubr.f32.gmra.mxu0 %v149_v58  ;;  %v145_v57 = vld [vmem:[%s2918_s0 + $0x418] sm:$0xff]  ;;  %v147_v58 = vld [vmem:[%s2918_s0 + $0x428] sm:$0xff] }
  0x61   :  { %628 = vmatmul.mubr.f32.gmra.mxu1 %v151_v59  ;;  %1541 = vmatprep.subr.mxu0 %v238_v60  ;;  %v144_v59 = vld [vmem:[%s2918_s0 + $0x410] sm:$0xff]  ;;  %v146_v60 = vld [vmem:[%s2918_s0 + $0x420] sm:$0xff] }
  0x62   :  { %1621 = vmatprep.subr.mxu1 %v270_v61  ;;  %1542 = vmatpush3.msra.mxu0 %v222_v62  ;;  %v154_v61 = vld [vmem:[%s2918_s0 + $0x460] sm:$0xff]  ;;  %v156_v62 = vld [vmem:[%s2918_s0 + $0x470] sm:$0xff] }
  0x63   :  { %1622 = vmatpush3.msra.mxu1 %v254_v63  ;;  %697 = vmatprep.mubr.f32.mxu0 %v19_v0  ;;  %v153_v63 = vld [vmem:[%s2918_s0 + $0x458] sm:$0xff]  ;;  %v155_v0 = vld [vmem:[%s2918_s0 + $0x468] sm:$0xff] }
  0x64   :  { %842 = vmatprep.mubr.f32.mxu1 %v21_v1  ;;  %698 = vmatmul.mubr.f32.vlgmr.msra.gmra.mxu0 %v18_v2  ;;  %v22_v1 = vld [vmem:[%s2918_s0 + $0x40] sm:$0xff] }
  0x65   :  { %843 = vmatmul.mubr.f32.vlgmr.msra.gmra.mxu1 %v20_v3  ;;  %1688 = vmatprep.subr.mxu0 %v286_v4  ;;  %v94_v2 = vld [vmem:[%s2918_s0 + $0x280] sm:$0xff]  ;;  %v31_v3 = vld [vmem:[%s2918_s0 + $0x88] sm:$0xff] }
  0x66   :  { %1714 = vmatprep.subr.mxu1 %v286_v4  ;;  %1689 = vmatpush3.msra.mxu0 %v286_v4 }
  0x67   :  { %1715 = vmatpush3.msra.mxu1 %v286_v4  ;;  %702 = vmatprep.mubr.f32.mxu0 %v28_v5  ;;  %v103_v4 = vld [vmem:[%s2918_s0 + $0x2c8] sm:$0xff]  ;;  %v40_v5 = vld [vmem:[%s2918_s0 + $0xd0] sm:$0xff] }
  0x68   :  { %847 = vmatprep.mubr.f32.mxu1 %v30_v6  ;;  %703 = vmatmul.mubr.f32.gmra.mxu0 %v27_v7  ;;  %v112_v6 = vld [vmem:[%s2918_s0 + $0x310] sm:$0xff]  ;;  %v49_v7 = vld [vmem:[%s2918_s0 + $0x118] sm:$0xff] }
  0x69   :  { %848 = vmatmul.mubr.f32.gmra.mxu1 %v29_v8  ;;  %707 = vmatprep.mubr.f32.mxu0 %v37_v9  ;;  %v121_v8 = vld [vmem:[%s2918_s0 + $0x358] sm:$0xff]  ;;  %v58_v9 = vld [vmem:[%s2918_s0 + $0x160] sm:$0xff] }
  0x6a   :  { %852 = vmatprep.mubr.f32.mxu1 %v39_v10  ;;  %v130_v10 = vld [vmem:[%s2918_s0 + $0x3a0] sm:$0xff] }
  0x6c   :  { %708 = vmatmul.mubr.f32.gmra.mxu0 %v36_v11  ;;  %v67_v11 = vld [vmem:[%s2918_s0 + $0x1a8] sm:$0xff] }
  0x6d   :  { %853 = vmatmul.mubr.f32.gmra.mxu1 %v38_v12  ;;  %712 = vmatprep.mubr.f32.mxu0 %v46_v13  ;;  %v139_v12 = vld [vmem:[%s2918_s0 + $0x3e8] sm:$0xff]  ;;  %v76_v13 = vld [vmem:[%s2918_s0 + $0x1f0] sm:$0xff] }
  0x6e   :  { %857 = vmatprep.mubr.f32.mxu1 %v48_v14  ;;  %v148_v14 = vld [vmem:[%s2918_s0 + $0x430] sm:$0xff] }
  0x70   :  { %713 = vmatmul.mubr.f32.gmra.mxu0 %v45_v15  ;;  %v85_v15 = vld [vmem:[%s2918_s0 + $0x238] sm:$0xff] }
  0x71   :  { %858 = vmatmul.mubr.f32.gmra.mxu1 %v47_v16  ;;  %717 = vmatprep.mubr.f32.mxu0 %v55_v17  ;;  %v157_v16 = vld [vmem:[%s2918_s0 + $0x478] sm:$0xff] }
  0x72   :  { %862 = vmatprep.mubr.f32.mxu1 %v57_v18 }
  0x74   :  { %718 = vmatmul.mubr.f32.gmra.mxu0 %v54_v19  ;;  %v2640_v19 = vld [vmem:[%s2920_s2] ss:$0 sm:$0xff] }
  0x75   :  { %863 = vmatmul.mubr.f32.gmra.mxu1 %v56_v20  ;;  %722 = vmatprep.mubr.f32.mxu0 %v64_v21 }
  0x76   :  { %867 = vmatprep.mubr.f32.mxu1 %v66_v22 }
  0x78   :  { %723 = vmatmul.mubr.f32.gmra.mxu0 %v63_v23 }
  0x79   :  { %868 = vmatmul.mubr.f32.gmra.mxu1 %v65_v24  ;;  %727 = vmatprep.mubr.f32.mxu0 %v73_v25 }
  0x7a   :  { %872 = vmatprep.mubr.f32.mxu1 %v75_v26 }
  0x7c   :  { %728 = vmatmul.mubr.f32.gmra.mxu0 %v72_v27 }
  0x7d   :  { %873 = vmatmul.mubr.f32.gmra.mxu1 %v74_v28  ;;  %732 = vmatprep.mubr.f32.mxu0 %v82_v29 }
  0x7e   :  { %877 = vmatprep.mubr.f32.mxu1 %v84_v30 }
  0x80   :  { %733 = vmatmul.mubr.f32.gmra.mxu0 %v81_v31 }
  0x81   :  { %878 = vmatmul.mubr.f32.gmra.mxu1 %v83_v32  ;;  %737 = vmatprep.mubr.f32.mxu0 %v91_v33 }
  0x82   :  { %882 = vmatprep.mubr.f32.mxu1 %v93_v34 }
  0x84   :  { %738 = vmatmul.mubr.f32.gmra.mxu0 %v90_v35 }
  0x85   :  { %883 = vmatmul.mubr.f32.gmra.mxu1 %v92_v36  ;;  %742 = vmatprep.mubr.f32.mxu0 %v100_v37 }
  0x86   :  { %887 = vmatprep.mubr.f32.mxu1 %v102_v38 }
  0x88   :  { %743 = vmatmul.mubr.f32.gmra.mxu0 %v99_v39 }
  0x89   :  { %888 = vmatmul.mubr.f32.gmra.mxu1 %v101_v40  ;;  %747 = vmatprep.mubr.f32.mxu0 %v109_v41 }
  0x8a   :  { %892 = vmatprep.mubr.f32.mxu1 %v111_v42 }
  0x8c   :  { %748 = vmatmul.mubr.f32.gmra.mxu0 %v108_v43 }
  0x8d   :  { %893 = vmatmul.mubr.f32.gmra.mxu1 %v110_v44  ;;  %752 = vmatprep.mubr.f32.mxu0 %v118_v45 }
  0x8e   :  { %897 = vmatprep.mubr.f32.mxu1 %v120_v46 }
  0x90   :  { %753 = vmatmul.mubr.f32.gmra.mxu0 %v117_v47 }
  0x91   :  { %898 = vmatmul.mubr.f32.gmra.mxu1 %v119_v48  ;;  %757 = vmatprep.mubr.f32.mxu0 %v127_v49 }
  0x92   :  { %902 = vmatprep.mubr.f32.mxu1 %v129_v50 }
  0x94   :  { %758 = vmatmul.mubr.f32.gmra.mxu0 %v126_v51 }
  0x95   :  { %903 = vmatmul.mubr.f32.gmra.mxu1 %v128_v52  ;;  %762 = vmatprep.mubr.f32.mxu0 %v136_v53 }
  0x96   :  { %907 = vmatprep.mubr.f32.mxu1 %v138_v54 }
  0x98   :  { %763 = vmatmul.mubr.f32.gmra.mxu0 %v135_v55 }
  0x99   :  { %908 = vmatmul.mubr.f32.gmra.mxu1 %v137_v56  ;;  %767 = vmatprep.mubr.f32.mxu0 %v145_v57 }
  0x9a   :  { %912 = vmatprep.mubr.f32.mxu1 %v147_v58 }
  0x9c   :  { %768 = vmatmul.mubr.f32.gmra.mxu0 %v144_v59 }
  0x9d   :  { %913 = vmatmul.mubr.f32.gmra.mxu1 %v146_v60  ;;  %772 = vmatprep.mubr.f32.mxu0 %v154_v61 }
  0x9e   :  { %917 = vmatprep.mubr.f32.mxu1 %v156_v62 }
  0xa0   :  { %773 = vmatmul.mubr.f32.gmra.mxu0 %v153_v63 }
  0xa1   :  { %918 = vmatmul.mubr.f32.gmra.mxu1 %v155_v0  ;;  %1690 = vmatprep.mubr.msk.f32.mxu0 %vm294_vm0, %v22_v1 }
  0xa2   :  { %1702 = vmatprep.mubr.msk.f32.mxu1 %vm294_vm0, %v94_v2 }
  0xa4   :  { %1691 = vmatmul.mubr.msk.f32.vlgmr.msra.gmra.mxu0 %vm294_vm0, %v31_v3 }
  0xa5   :  { %1703 = vmatmul.mubr.msk.f32.vlgmr.msra.gmra.mxu1 %vm294_vm0, %v103_v4  ;;  %1693 = vmatprep.mubr.msk.f32.mxu0 %vm294_vm0, %v40_v5 }
  0xa6   :  { %1705 = vmatprep.mubr.msk.f32.mxu1 %vm294_vm0, %v112_v6 }
  0xa8   :  { %1694 = vmatmul.mubr.msk.f32.gmra.mxu0 %vm294_vm0, %v49_v7 }
  0xa9   :  { %1706 = vmatmul.mubr.msk.f32.gmra.mxu1 %vm294_vm0, %v121_v8  ;;  %1696 = vmatprep.mubr.msk.f32.mxu0 %vm294_vm0, %v58_v9 }
  0xaa   :  { %1708 = vmatprep.mubr.msk.f32.mxu1 %vm294_vm0, %v130_v10 }
  0xac   :  { %1697 = vmatmul.mubr.msk.f32.gmra.mxu0 %vm294_vm0, %v67_v11 }
  0xad   :  { %1709 = vmatmul.mubr.msk.f32.gmra.mxu1 %vm294_vm0, %v139_v12  ;;  %1699 = vmatprep.mubr.msk.f32.mxu0 %vm294_vm0, %v76_v13 }
  0xae   :  { %1711 = vmatprep.mubr.msk.f32.mxu1 %vm294_vm0, %v148_v14 }
  0xb0   :  { %1700 = vmatmul.mubr.msk.f32.gmra.mxu0 %vm294_vm0, %v85_v15 }
  0xb1   :  { %1712 = vmatmul.mubr.msk.f32.gmra.mxu1 %vm294_vm0, %v157_v16 }
  0xe4   :  { %v1383_v17 = vpop.f32.mrf.mxu0 }
  0xe5   :  { %v1463_v18 = vpop.f32.mrf.mxu1 }
  0xe6   :  { %v1384_v20 = vpop.f32.mrf.mxu0 }
  0xe7   :  { %v1464_v21 = vpop.f32.mrf.mxu1  ;;  %v1385_v22 = vadd.f32 %v1384_v20, %v1383_v17 }
  0xe8   :  { %v1465_v23 = vadd.f32 %v1464_v21, %v1463_v18  ;;  %v1386_v24 = vpop.f32.mrf.mxu0 }
  0xe9   :  { %v1466_v25 = vpop.f32.mrf.mxu1  ;;  %v410_v26 = vadd.f32 %v1385_v22, %v2640_v19 }
  0xea   :  { %v1387_v27 = vpop.f32.mrf.mxu0 }
  0xeb   :  { %v1467_v28 = vpop.f32.mrf.mxu1  ;;  %v2643_v29 = vadd.f32 %v1465_v23, %v410_v26  ;;  %v1388_v30 = vadd.f32 %v1387_v27, %v1386_v24 }
  0xec   :  { %v1468_v31 = vadd.f32 %v1467_v28, %v1466_v25  ;;  %v1389_v32 = vpop.f32.mrf.mxu0 }
  0xed   :  { %v1469_v33 = vpop.f32.mrf.mxu1  ;;  %v415_v34 = vadd.f32 %v1388_v30, %v2640_v19 }
  0xee   :  { %v1390_v35 = vpop.f32.mrf.mxu0 }
  0xef   :  { %v1470_v36 = vpop.f32.mrf.mxu1  ;;  %v2646_v37 = vadd.f32 %v1468_v31, %v415_v34  ;;  %v1391_v38 = vadd.f32 %v1390_v35, %v1389_v32 }
  0xf0   :  { %v1471_v39 = vadd.f32 %v1470_v36, %v1469_v33  ;;  %v1392_v40 = vpop.f32.mrf.mxu0 }
  0xf1   :  { %v1472_v41 = vpop.f32.mrf.mxu1  ;;  %v420_v42 = vadd.f32 %v1391_v38, %v2640_v19 }
  0xf2   :  { %v1393_v43 = vpop.f32.mrf.mxu0 }
  0xf3   :  { %v1473_v44 = vpop.f32.mrf.mxu1  ;;  %v2649_v45 = vadd.f32 %v1471_v39, %v420_v42  ;;  %v1394_v46 = vadd.f32 %v1393_v43, %v1392_v40 }
  0xf4   :  { %v1474_v47 = vadd.f32 %v1473_v44, %v1472_v41  ;;  %v1395_v48 = vpop.f32.mrf.mxu0 }
  0xf5   :  { %v1475_v49 = vpop.f32.mrf.mxu1  ;;  %v425_v50 = vadd.f32 %v1394_v46, %v2640_v19 }
  0xf6   :  { %v1396_v51 = vpop.f32.mrf.mxu0 }
  0xf7   :  { %v1476_v52 = vpop.f32.mrf.mxu1  ;;  %v2652_v53 = vadd.f32 %v1474_v47, %v425_v50  ;;  %v1397_v54 = vadd.f32 %v1396_v51, %v1395_v48 }
  0xf8   :  { %v1477_v55 = vadd.f32 %v1476_v52, %v1475_v49  ;;  %v1398_v56 = vpop.f32.mrf.mxu0 }
  0xf9   :  { %v1478_v57 = vpop.f32.mrf.mxu1  ;;  %v430_v58 = vadd.f32 %v1397_v54, %v2640_v19 }
  0xfa   :  { %v1399_v59 = vpop.f32.mrf.mxu0 }
  0xfb   :  { %v1479_v60 = vpop.f32.mrf.mxu1  ;;  %v2655_v61 = vadd.f32 %v1477_v55, %v430_v58  ;;  %v1400_v62 = vadd.f32 %v1399_v59, %v1398_v56 }
  0xfc   :  { %v1480_v63 = vadd.f32 %v1479_v60, %v1478_v57  ;;  %v1401_v0 = vpop.f32.mrf.mxu0 }
  0xfd   :  { %v1481_v1 = vpop.f32.mrf.mxu1  ;;  %v435_v2 = vadd.f32 %v1400_v62, %v2640_v19 }
  0xfe   :  { %v1402_v3 = vpop.f32.mrf.mxu0 }
  0xff   :  { %v1482_v4 = vpop.f32.mrf.mxu1  ;;  %v2658_v5 = vadd.f32 %v1480_v63, %v435_v2  ;;  %v1403_v6 = vadd.f32 %v1402_v3, %v1401_v0 }
 0x100   :  { %v1483_v7 = vadd.f32 %v1482_v4, %v1481_v1  ;;  %v1404_v8 = vpop.f32.mrf.mxu0 }
 0x101   :  { %v1484_v9 = vpop.f32.mrf.mxu1  ;;  %v440_v10 = vadd.f32 %v1403_v6, %v2640_v19 }
 0x102   :  { %v1405_v11 = vpop.f32.mrf.mxu0 }
 0x103   :  { %v1485_v12 = vpop.f32.mrf.mxu1  ;;  %v2661_v13 = vadd.f32 %v1483_v7, %v440_v10  ;;  %v1406_v14 = vadd.f32 %v1405_v11, %v1404_v8 }
 0x104   :  { %v1486_v15 = vadd.f32 %v1485_v12, %v1484_v9  ;;  %v1407_v16 = vpop.f32.mrf.mxu0 }
 0x105   :  { %2922 = vst [vmem:[#allocation3_spill] sm:$0xff] %v2661_v13  ;;  %v1487_v17 = vpop.f32.mrf.mxu1  ;;  %v445_v18 = vadd.f32 %v1406_v14, %v2640_v19 }
 0x106   :  { %v1408_v20 = vpop.f32.mrf.mxu0 }
 0x107   :  { %v1488_v21 = vpop.f32.mrf.mxu1  ;;  %v2664_v22 = vadd.f32 %v1486_v15, %v445_v18  ;;  %v1409_v23 = vadd.f32 %v1408_v20, %v1407_v16 }
 0x108   :  { %v1489_v24 = vadd.f32 %v1488_v21, %v1487_v17  ;;  %v1410_v25 = vpop.f32.mrf.mxu0 }
 0x109   :  { %2923 = vst [vmem:[#allocation4_spill] sm:$0xff] %v2664_v22  ;;  %v1490_v26 = vpop.f32.mrf.mxu1  ;;  %v450_v27 = vadd.f32 %v1409_v23, %v2640_v19 }
 0x10a   :  { %v1411_v28 = vpop.f32.mrf.mxu0 }
 0x10b   :  { %v1491_v30 = vpop.f32.mrf.mxu1  ;;  %v2667_v31 = vadd.f32 %v1489_v24, %v450_v27  ;;  %v1412_v32 = vadd.f32 %v1411_v28, %v1410_v25 }
 0x10c   :  { %v1492_v33 = vadd.f32 %v1491_v30, %v1490_v26  ;;  %v1413_v34 = vpop.f32.mrf.mxu0 }
 0x10d   :  { %v1493_v35 = vpop.f32.mrf.mxu1  ;;  %v455_v36 = vadd.f32 %v1412_v32, %v2640_v19 }
 0x10e   :  { %v1414_v38 = vpop.f32.mrf.mxu0 }
 0x10f   :  { %v1494_v39 = vpop.f32.mrf.mxu1  ;;  %v2670_v40 = vadd.f32 %v1492_v33, %v455_v36  ;;  %v1415_v41 = vadd.f32 %v1414_v38, %v1413_v34 }
 0x110   :  { %v1495_v42 = vadd.f32 %v1494_v39, %v1493_v35  ;;  %v1416_v43 = vpop.f32.mrf.mxu0 }
 0x111   :  { %v1496_v44 = vpop.f32.mrf.mxu1  ;;  %v460_v46 = vadd.f32 %v1415_v41, %v2640_v19 }
 0x112   :  { %v1417_v47 = vpop.f32.mrf.mxu0 }
 0x113   :  { %v1497_v48 = vpop.f32.mrf.mxu1  ;;  %v2673_v49 = vadd.f32 %v1495_v42, %v460_v46  ;;  %v1418_v50 = vadd.f32 %v1417_v47, %v1416_v43 }
 0x114   :  { %v1498_v51 = vadd.f32 %v1497_v48, %v1496_v44  ;;  %v1419_v52 = vpop.f32.mrf.mxu0 }
 0x115   :  { %v1499_v54 = vpop.f32.mrf.mxu1  ;;  %v465_v55 = vadd.f32 %v1418_v50, %v2640_v19 }
 0x116   :  { %v1420_v56 = vpop.f32.mrf.mxu0 }
 0x117   :  { %v1500_v57 = vpop.f32.mrf.mxu1  ;;  %v2676_v58 = vadd.f32 %v1498_v51, %v465_v55  ;;  %v1421_v59 = vadd.f32 %v1420_v56, %v1419_v52 }
 0x118   :  { %v1501_v60 = vadd.f32 %v1500_v57, %v1499_v54  ;;  %v1422_v62 = vpop.f32.mrf.mxu0 }
 0x119   :  { %v1502_v63 = vpop.f32.mrf.mxu1  ;;  %v470_v0 = vadd.f32 %v1421_v59, %v2640_v19 }
 0x11a   :  { %v1423_v1 = vpop.f32.mrf.mxu0 }
 0x11b   :  { %v1503_v2 = vpop.f32.mrf.mxu1  ;;  %v2679_v3 = vadd.f32 %v1501_v60, %v470_v0  ;;  %v1424_v4 = vadd.f32 %v1423_v1, %v1422_v62 }
 0x11c   :  { %v1504_v6 = vadd.f32 %v1503_v2, %v1502_v63  ;;  %v1425_v7 = vpop.f32.mrf.mxu0 }
 0x11d   :  { %v1505_v8 = vpop.f32.mrf.mxu1  ;;  %v475_v9 = vadd.f32 %v1424_v4, %v2640_v19 }
 0x11e   :  { %v1426_v10 = vpop.f32.mrf.mxu0 }
 0x11f   :  { %v1506_v11 = vpop.f32.mrf.mxu1  ;;  %v2682_v12 = vadd.f32 %v1504_v6, %v475_v9  ;;  %v1427_v14 = vadd.f32 %v1426_v10, %v1425_v7 }
 0x120   :  { %v1507_v15 = vadd.f32 %v1506_v11, %v1505_v8  ;;  %v1428_v16 = vpop.f32.mrf.mxu0 }
 0x121   :  { %2924 = vst [vmem:[#allocation5_spill] sm:$0xff] %v2682_v12  ;;  %v1508_v17 = vpop.f32.mrf.mxu1  ;;  %v480_v18 = vadd.f32 %v1427_v14, %v2640_v19 }
 0x122   :  { %v1429_v20 = vpop.f32.mrf.mxu0 }
 0x123   :  { %v1509_v21 = vpop.f32.mrf.mxu1  ;;  %v2685_v23 = vadd.f32 %v1507_v15, %v480_v18  ;;  %v1430_v24 = vadd.f32 %v1429_v20, %v1428_v16 }
 0x124   :  { %v1510_v25 = vadd.f32 %v1509_v21, %v1508_v17  ;;  %v1543_v26 = vpop.f32.mrf.mxu0 }
 0x125   :  { %2925 = vst [vmem:[#allocation6_spill] sm:$0xff] %v2685_v23  ;;  %v1623_v27 = vpop.f32.mrf.mxu1  ;;  %v485_v28 = vadd.f32 %v1430_v24, %v2640_v19 }
 0x126   :  { %v1544_v30 = vpop.f32.mrf.mxu0 }
 0x127   :  { %v1624_v32 = vpop.f32.mrf.mxu1  ;;  %v2688_v33 = vadd.f32 %v1510_v25, %v485_v28  ;;  %v1545_v34 = vadd.f32 %v1544_v30, %v1543_v26 }
 0x128   :  { %v1546_v35 = vpop.f32.mrf.mxu0  ;;  %v1625_v39 = vadd.f32 %v1624_v32, %v1623_v27 }
 0x129   :  { %2926 = vst [vmem:[#allocation7_spill] sm:$0xff] %v2688_v33  ;;  %v2690_v36 = vpop.f32.mrf.mxu1  ;;  %v700_v38 = vadd.f32 %v1545_v34, %v2643_v29 }
 0x12a   :  { %v1547_v41 = vpop.f32.mrf.mxu0 }
 0x12b   :  { %v2693_v42 = vpop.f32.mrf.mxu1  ;;  %v2695_v43 = vadd.f32 %v1625_v39, %v700_v38  ;;  %v1548_v33 = vadd.f32 %v1547_v41, %v1546_v35 }
 0x12c   :  { %v1549_v44 = vpop.f32.mrf.mxu0  ;;  %v1628_v35 = vadd.f32 %v2693_v42, %v2690_v36 }
 0x12d   :  { %v1629_v46 = vpop.f32.mrf.mxu1  ;;  %v705_v13 = vadd.f32 %v1548_v33, %v2646_v37 }
 0x12e   :  { %v1550_v47 = vpop.f32.mrf.mxu0 }
 0x12f   :  { %v1630_v19 = vpop.f32.mrf.mxu1  ;;  %v1551_v48 = vadd.f32 %v1550_v47, %v1549_v44 }
 0x130   :  { %v1552_v50 = vpop.f32.mrf.mxu0  ;;  %v1631_v54 = vadd.f32 %v1630_v19, %v1629_v46 }
 0x131   :  { %v2697_v51 = vpop.f32.mrf.mxu1  ;;  %v710_v52 = vadd.f32 %v1551_v48, %v2649_v45 }
 0x132   :  { %v1553_v55 = vpop.f32.mrf.mxu0 }
 0x133   :  { %v1633_v56 = vpop.f32.mrf.mxu1  ;;  %v2700_v29 = vadd.f32 %v1631_v54, %v710_v52 }
 0x134   :  { %v2702_v57 = vpop.f32.mrf.mxu0 }
 0x135   :  { %v2704_v59 = vpop.f32.mrf.mxu1 }
 0x136   :  { %v2706_v60 = vpop.f32.mrf.mxu0 }
 0x137   :  { %v2708_v62 = vpop.f32.mrf.mxu1 }
 0x138   :  { %v2710_v63 = vpop.f32.mrf.mxu0 }
 0x139   :  { %v2712_v0 = vpop.f32.mrf.mxu1 }
 0x13a   :  { %v2714_v1 = vpop.f32.mrf.mxu0 }
 0x13b   :  { %v2716_v45 = vpop.f32.mrf.mxu1 }
 0x13c   :  { %v2718_v2 = vpop.f32.mrf.mxu0 }
 0x13d   :  { %v2720_v4 = vpop.f32.mrf.mxu1 }
 0x13e   :  { %2927 = vst [vmem:[#allocation8_spill] sm:$0xff] %v2720_v4  ;;  %v2722_v6 = vpop.f32.mrf.mxu0 }
 0x13f   :  { %v2724_v7 = vpop.f32.mrf.mxu1 }
 0x140   :  { %2928 = vst [vmem:[#allocation9_spill] sm:$0xff] %v2724_v7  ;;  %v2726_v8 = vpop.f32.mrf.mxu0  ;;  %v1554_v7 = vadd.f32 %v1553_v55, %v1552_v50 }
 0x141   :  { %v2728_v9 = vpop.f32.mrf.mxu1 }
 0x142   :  { %2929 = vst [vmem:[#allocation10_spill] sm:$0xff] %v2728_v9  ;;  %v2730_v10 = vpop.f32.mrf.mxu0  ;;  %v715_v50 = vadd.f32 %v1554_v7, %v2652_v53 }
 0x143   :  { %v2732_v11 = vpop.f32.mrf.mxu1 }
 0x144   :  { %2930 = vst [vmem:[#allocation11_spill] sm:$0xff] %v2732_v11  ;;  %v1567_v14 = vpop.f32.mrf.mxu0 }
 0x145   :  { %v1647_v15 = vpop.f32.mrf.mxu1 }
 0x146   :  { %v1568_v16 = vpop.f32.mrf.mxu0 }
 0x147   :  { %v1648_v17 = vpop.f32.mrf.mxu1 }
 0x148   :  { %v1570_v18 = vpop.f32.mrf.mxu0  ;;  %v1649_v53 = vadd.f32 %v1648_v17, %v1647_v15 }
 0x149   :  { %v1650_v20 = vpop.f32.mrf.mxu1 }
 0x14a   :  { %v1571_v21 = vpop.f32.mrf.mxu0 }
 0x14b   :  { %v1651_v24 = vpop.f32.mrf.mxu1  ;;  %v1572_v23 = vadd.f32 %v1571_v21, %v1570_v18 }
 0x14c   :  { %v1573_v25 = vpop.f32.mrf.mxu0  ;;  %v1652_v41 = vadd.f32 %v1651_v24, %v1650_v20 }
 0x14d   :  { %v1653_v26 = vpop.f32.mrf.mxu1 }
 0x14e   :  { %v1574_v27 = vpop.f32.mrf.mxu0 }
 0x14f   :  { %v1654_v28 = vpop.f32.mrf.mxu1 }
 0x150   :  { %v1576_v30 = vpop.f32.mrf.mxu0 }
 0x151   :  { %v1656_v32 = vpop.f32.mrf.mxu1 }
 0x152   :  { %v1577_v34 = vpop.f32.mrf.mxu0 }
 0x153   :  { %v1657_v38 = vpop.f32.mrf.mxu1  ;;  %v1578_v18 = vadd.f32 %v1577_v34, %v1576_v30 }
 0x154   :  { %v2734_v39 = vpop.f32.mrf.mxu0 }
 0x155   :  { %v2736_v44 = vpop.f32.mrf.mxu1  ;;  %v755_v36 = vadd.f32 %v1578_v18, %v2676_v58  ;;  %v1560_v58 = vadd.f32 %v2714_v1, %v2710_v63  ;;  %v1637_v18 = vadd.f32 %v2708_v62, %v2704_v59  ;;  %v1566_v59 = vadd.f32 %v2730_v10, %v2726_v8  ;;  %v2939_v10 = vld [vmem:[#allocation3_spill] sm:$0xff] }
 0x156   :  { %2931 = vst [vmem:[#allocation12_spill] sm:$0xff] %v2736_v44  ;;  %v2738_v46 = vpop.f32.mrf.mxu0  ;;  %v1569_v44 = vadd.f32 %v1568_v16, %v1567_v14  ;;  %v1575_v16 = vadd.f32 %v1574_v27, %v1573_v25 }
 0x157   :  { %v2740_v47 = vpop.f32.mrf.mxu1 }
 0x158   :  { %2932 = vst [vmem:[#allocation13_spill] sm:$0xff] %v2740_v47  ;;  %v2742_v19 = vpop.f32.mrf.mxu0  ;;  %v745_v47 = vadd.f32 %v1572_v23, %v2670_v40  ;;  %v1634_v40 = vadd.f32 %v1633_v56, %v2697_v51  ;;  %v740_v23 = vadd.f32 %v1569_v44, %v2667_v31  ;;  %v750_v17 = vadd.f32 %v1575_v16, %v2673_v49 }
 0x159   :  { %v2744_v48 = vpop.f32.mrf.mxu1 }
 0x15a   :  { %2933 = vst [vmem:[#allocation14_spill] sm:$0xff] %v2744_v48  ;;  %v1583_v52 = vpop.f32.mrf.mxu0  ;;  %v890_v37 = vadd.f32 %v1652_v41, %v745_v47  ;;  %v860_v30 = vadd.f32 %v1634_v40, %v715_v50  ;;  %v1640_v50 = vadd.f32 %v2716_v45, %v2712_v0  ;;  %v2935_v0 = vld [vmem:[#allocation5_spill] sm:$0xff] }
 0x15b   :  { %v2746_v54 = vpop.f32.mrf.mxu1 }
 0x15c   :  { %v2748_v11 = vpop.f32.mrf.mxu0 }
 0x15d   :  { %v2750_v9 = vpop.f32.mrf.mxu1 }
 0x15e   :  { %v2752_v4 = vpop.f32.mrf.mxu0 }
 0x15f   :  { %v2754_v22 = vpop.f32.mrf.mxu1 }
 0x160   :  { %2934 = vst [vmem:[#allocation15_spill] sm:$0xff] %v2754_v22  ;;  %v2758_v48 = vpop.f32.mrf.mxu0  ;;  %v850_v22 = vadd.f32 %v1628_v35, %v705_v13  ;;  %v1658_v13 = vadd.f32 %v1657_v38, %v1656_v32  ;;  %v1655_v32 = vadd.f32 %v1654_v28, %v1653_v26  ;;  %v725_v35 = vadd.f32 %v1560_v58, %v2658_v5  ;;  %v2941_v58 = vld [vmem:[#allocation8_spill] sm:$0xff] }
 0x161   :  { %v2760_v12 = vpop.f32.mrf.mxu1  ;;  %v1581_v26 = vadd.f32 %v2738_v46, %v2734_v39  ;;  %v1584_v28 = vadd.f32 %v1583_v52, %v2742_v19  ;;  %v1563_v46 = vadd.f32 %v2722_v6, %v2718_v2  ;;  %v2938_v16 = vld [vmem:[#allocation14_spill] sm:$0xff] }
 0x162   :  { %v2765_v55 = vpop.f32.mrf.mxu0  ;;  %v900_v27 = vadd.f32 %v1658_v13, %v755_v36  ;;  %v895_v41 = vadd.f32 %v1655_v32, %v750_v17  ;;  %v870_v52 = vadd.f32 %v1640_v50, %v725_v35  ;;  %v1664_v36 = vadd.f32 %v2746_v54, %v2938_v16  ;;  %v2943_v17 = vld [vmem:[#allocation10_spill] sm:$0xff] }
 0x163   :  { %v2767_v21 = vpop.f32.mrf.mxu1  ;;  %v765_v45 = vadd.f32 %v1584_v28, %v2935_v0  ;;  %v1587_v54 = vadd.f32 %v2752_v4, %v2748_v11 }
 0x164   :  { %v1692_v33 = vpop.f32.mrf.mxu0 }
 0x165   :  { %v1704_v14 = vpop.f32.mrf.mxu1  ;;  %v2772_v42 = vadd.f32 %v1692_v33, %v850_v22  ;;  %v1557_v22 = vadd.f32 %v2706_v60, %v2702_v57  ;;  %v2937_v33 = vld [vmem:[#allocation13_spill] sm:$0xff] }
 0x166   :  { %v2774_v20 = vadd.f32 %v1704_v14, %v890_v37  ;;  %v989_v7 = vpop.f32.mrf.mxu0 }
 0x167   :  { %v1029_v24 = vpop.f32.mrf.mxu1  ;;  %v2777_v34 = vadd.f32 %v989_v7, %v2695_v43  ;;  %v1072_v51 = vsel %vm1068_vm1, %v2772_v42, -inf  ;;  %v885_v43 = vadd.f32 %v1649_v53, %v740_v23  ;;  %v720_v63 = vadd.f32 %v1557_v22, %v2655_v61  ;;  %v2936_v23 = vld [vmem:[#allocation12_spill] sm:$0xff] }
 0x168   :  { %v1096_v31 = vsel %vm1068_vm1, %v2774_v20, -inf  ;;  %v1695_v56 = vpop.f32.mrf.mxu0  ;;  %1073 = vmax.xlane.f32.xlu0 %v1072_v51  ;;  %v1661_v14 = vadd.f32 %v2937_v33, %v2936_v23  ;;  %v730_v53 = vadd.f32 %v1563_v46, %v2939_v10  ;;  %v2940_v7 = vld [vmem:[#allocation4_spill] sm:$0xff]  ;;  %v910_v51 = vadd.f32 %v1664_v36, %v765_v45 }
 0x169   :  { %v1707_v15 = vpop.f32.mrf.mxu1  ;;  %1097 = vmax.xlane.f32.xlu1 %v1096_v31  ;;  %v2788_v25 = vadd.f32 %v1695_v56, %v860_v30  ;;  %v2790_v44 = vadd.f32 %v1029_v24, %v885_v43  ;;  %v1069_v60 = vsel %vm1068_vm1, %v2777_v34, -inf  ;;  %v865_v40 = vadd.f32 %v1637_v18, %v720_v63  ;;  %v2942_v56 = vld [vmem:[#allocation9_spill] sm:$0xff]  ;;  %v2944_v43 = vld [vmem:[#allocation11_spill] sm:$0xff] }
 0x16a   :  { %v999_v38 = vpop.f32.mrf.mxu0  ;;  %v2792_v47 = vadd.f32 %v1707_v15, %v900_v27  ;;  %v735_v24 = vadd.f32 %v1566_v59, %v2940_v7  ;;  %v1590_v31 = vadd.f32 %v2765_v55, %v2758_v48  ;;  %v1643_v15 = vadd.f32 %v2942_v56, %v2941_v58  ;;  %v2945_v55 = vld [vmem:[#allocation6_spill] sm:$0xff]  ;;  %v2946_v63 = vld [vmem:[#allocation7_spill] sm:$0xff] }
 0x16b   :  { %v1078_v57 = vsel %vm1068_vm1, %v2788_v25, -inf  ;;  %v1039_v1 = vpop.f32.mrf.mxu1  ;;  %v2808_v61 = vadd.f32 %v999_v38, %v2700_v29  ;;  %v1093_v39 = vsel %vm1068_vm1, %v2790_v44, -inf  ;;  %v760_v29 = vadd.f32 %v1581_v26, %v2679_v3  ;;  %v2947_v26 = vld [vmem:[#allocation15_spill] sm:$0xff] }
 0x16c   :  { %v1698_v49 = vpop.f32.mrf.mxu0  ;;  %1070 = vmax.xlane.f32.xlu0 %v1069_v60  ;;  %v2810_v37 = vadd.f32 %v1039_v1, %v895_v41  ;;  %v1102_v5 = vsel %vm1068_vm1, %v2792_v47, -inf  ;;  %v1646_v27 = vadd.f32 %v2944_v43, %v2943_v17  ;;  %v770_v60 = vadd.f32 %v1587_v54, %v2945_v55 }
 0x16d   :  { %1079 = vmax.xlane.f32.xlu1 %v1078_v57  ;;  %v1710_v62 = vpop.f32.mrf.mxu1  ;;  %v2826_v2 = vadd.f32 %v1698_v49, %v870_v52  ;;  %v1075_v8 = vsel %vm1068_vm1, %v2808_v61, -inf  ;;  %v905_v22 = vadd.f32 %v1661_v14, %v760_v29  ;;  %v775_v1 = vadd.f32 %v1590_v31, %v2946_v63 }
 0x16e   :  { %v1009_v19 = vpop.f32.mrf.mxu0  ;;  %v1099_v3 = vsel %vm1068_vm1, %v2810_v37, -inf  ;;  %v2844_v32 = vadd.f32 %v1710_v62, %v910_v51  ;;  %v880_v49 = vadd.f32 %v1646_v27, %v735_v24  ;;  %v875_v35 = vadd.f32 %v1643_v15, %v730_v53 }
 0x16f   :  { %v2828_v6 = vadd.f32 %v1009_v19, %v865_v40  ;;  %v1049_v30 = vpop.f32.mrf.mxu1  ;;  %v1084_v57 = vsel %vm1068_vm1, %v2826_v2, -inf  ;;  %v1667_v28 = vadd.f32 %v2947_v26, %v2750_v9  ;;  %v1670_v41 = vadd.f32 %v2767_v21, %v2760_v12 }
 0x170   :  { %1094 = vmax.xlane.f32.xlu0 %v1093_v39  ;;  %v1701_v13 = vpop.f32.mrf.mxu0  ;;  %v2846_v38 = vadd.f32 %v1049_v30, %v905_v22 }
 0x171   :  { %1103 = vmax.xlane.f32.xlu1 %v1102_v5  ;;  %v1081_v4 = vsel %vm1068_vm1, %v2828_v6, -inf  ;;  %v1713_v11 = vpop.f32.mrf.mxu1  ;;  %v2858_v18 = vadd.f32 %v1701_v13, %v880_v49  ;;  %v1108_v5 = vsel %vm1068_vm1, %v2844_v32, -inf  ;;  %v920_v59 = vadd.f32 %v1670_v41, %v775_v1 }
 0x172   :  { %v1019_v48 = vpop.f32.mrf.mxu0  ;;  %v1105_v39 = vsel %vm1068_vm1, %v2846_v38, -inf  ;;  %v915_v62 = vadd.f32 %v1667_v28, %v770_v60 }
 0x173   :  { %v2860_v50 = vadd.f32 %v1019_v48, %v875_v35  ;;  %v1059_v46 = vpop.f32.mrf.mxu1  ;;  %v2866_v19 = vadd.f32 %v1713_v11, %v920_v59  ;;  %v1090_v12 = vsel %vm1068_vm1, %v2858_v18, -inf }
 0x174   :  { %1100 = vmax.xlane.f32.xlu0 %v1099_v3  ;;  %v2868_v9 = vadd.f32 %v1059_v46, %v915_v62 }
 0x175   :  { %1076 = vmax.xlane.f32.xlu1 %v1075_v8  ;;  %v1087_v21 = vsel %vm1068_vm1, %v2860_v50, -inf  ;;  %v1114_v29 = vsel %vm1068_vm1, %v2866_v19, -inf }
 0x176   :  { %v1111_v0 = vsel %vm1068_vm1, %v2868_v9, -inf }
 0x178   :  { %1082 = vmax.xlane.f32.xlu0 %v1081_v4 }
 0x179   :  { %1085 = vmax.xlane.f32.xlu1 %v1084_v57 }
 0x17c   :  { %1106 = vmax.xlane.f32.xlu0 %v1105_v39 }
 0x17d   :  { %1109 = vmax.xlane.f32.xlu1 %v1108_v5 }
 0x180   :  { %1088 = vmax.xlane.f32.xlu0 %v1087_v21 }
 0x181   :  { %1091 = vmax.xlane.f32.xlu1 %v1090_v12 }
 0x184   :  { %1112 = vmax.xlane.f32.xlu0 %v1111_v0 }
 0x185   :  { %1115 = vmax.xlane.f32.xlu1 %v1114_v29 }
 0x1f1   :  { %v1074_v52 = vpop.xlane.xlu0 %1073 }
 0x1f2   :  { %v1098_v45 = vpop.xlane.xlu1 %1097  ;;  %v1118_v23 = vsub.f32 %v2772_v42, %v1074_v52 }
 0x1f3   :  { %v1126_v40 = vsub.f32 %v2774_v20, %v1098_v45 }
 0x1f4   :  { %v1135_v33 = vmul.f32 1.442695, %v1118_v23 }
 0x1f5   :  { %v1151_v14 = vmul.f32 1.442695, %v1126_v40  ;;  %v1071_v36 = vpop.xlane.xlu0 %1070 }
 0x1f6   :  { %v1080_v16 = vpop.xlane.xlu1 %1079  ;;  %v1117_v3 = vsub.f32 %v2777_v34, %v1071_v36  ;;  %1717 = vpow2.f32 %v1135_v33 }
 0x1f7   :  { %v1120_v8 = vsub.f32 %v2788_v25, %v1080_v16  ;;  %1719 = vpow2.f32 %v1151_v14 }
 0x1f8   :  { %v1133_v10 = vmul.f32 1.442695, %v1117_v3 }
 0x1f9   :  { %v1139_v53 = vmul.f32 1.442695, %v1120_v8  ;;  %v1095_v24 = vpop.xlane.xlu0 %1094 }
 0x1fa   :  { %v1104_v7 = vpop.xlane.xlu1 %1103  ;;  %v1125_v20 = vsub.f32 %v2790_v44, %v1095_v24  ;;  %1721 = vpow2.f32 %v1133_v10 }
 0x1fb   :  { %v1128_v30 = vsub.f32 %v2792_v47, %v1104_v7  ;;  %1723 = vpow2.f32 %v1139_v53 }
 0x1fc   :  { %v1149_v42 = vmul.f32 1.442695, %v1125_v20 }
 0x1fd   :  { %v1155_v13 = vmul.f32 1.442695, %v1128_v30  ;;  %v1101_v31 = vpop.xlane.xlu0 %1100 }
 0x1fe   :  { %v1077_v54 = vpop.xlane.xlu1 %1076  ;;  %v1127_v34 = vsub.f32 %v2810_v37, %v1101_v31  ;;  %1725 = vpow2.f32 %v1149_v42 }
 0x1ff   :  { %v1119_v25 = vsub.f32 %v2808_v61, %v1077_v54  ;;  %1727 = vpow2.f32 %v1155_v13 }
 0x200   :  { %v1153_v22 = vmul.f32 1.442695, %v1127_v34 }
 0x201   :  { %v1137_v51 = vmul.f32 1.442695, %v1119_v25  ;;  %v1083_v56 = vpop.xlane.xlu0 %1082 }
 0x202   :  { %v1086_v58 = vpop.xlane.xlu1 %1085  ;;  %v1121_v44 = vsub.f32 %v2828_v6, %v1083_v56 }
 0x203   :  { %1729 = vpow2.f32 %v1137_v51  ;;  %v1122_v47 = vsub.f32 %v2826_v2, %v1086_v58  ;;  %v1718_v15 = vpop.eup %1717 }
 0x204   :  { %1731 = vpow2.f32 %v1153_v22  ;;  %v1141_v43 = vmul.f32 1.442695, %v1121_v44  ;;  %v1168_v61 = vsel %vm1068_vm1, %v1718_v15, 0.0  ;;  %v1720_v37 = vpop.eup %1719 }
 0x205   :  { %v1143_v17 = vmul.f32 1.442695, %v1122_v47  ;;  %v1107_v57 = vpop.xlane.xlu0 %1106  ;;  %1169 = vadd.xlane.f32.xlu1 %v1168_v61  ;;  %v1192_v60 = vsel %vm1068_vm1, %v1720_v37, 0.0 }
 0x206   :  { %v1110_v27 = vpop.xlane.xlu1 %1109  ;;  %v1129_v11 = vsub.f32 %v2846_v38, %v1107_v57  ;;  %v1781_v57 = vmov 0.0  }
 0x207   :  { %1733 = vpow2.f32 %v1143_v17  ;;  %v1130_v4 = vsub.f32 %v2844_v32, %v1110_v27  ;;  %v2891_v48 = vpop.eup %1721 }
 0x208   :  { %1735 = vpow2.f32 %v1141_v43  ;;  %v1157_v6 = vmul.f32 1.442695, %v1129_v11  ;;  %v1165_v63 = vsel %vm1068_vm1, %v2891_v48, 0.0  ;;  %v1724_v49 = vpop.eup %1723 }
 0x209   :  { %v1159_v2 = vmul.f32 1.442695, %v1130_v4  ;;  %v1089_v1 = vpop.xlane.xlu0 %1088  ;;  %1193 = vadd.xlane.f32.xlu1 %v1192_v60  ;;  %1166 = vadd.xlane.f32.xlu0 %v1165_v63  ;;  %v1174_v5 = vsel %vm1068_vm1, %v1724_v49, 0.0 }
 0x20a   :  { %v1092_v55 = vpop.xlane.xlu1 %1091  ;;  %v1123_v32 = vsub.f32 %v2860_v50, %v1089_v1 }
 0x20b   :  { %1737 = vpow2.f32 %v1159_v2  ;;  %v1124_v35 = vsub.f32 %v2858_v18, %v1092_v55  ;;  %v1726_v38 = vpop.eup %1725 }
 0x20c   :  { %1739 = vpow2.f32 %v1157_v6  ;;  %v1145_v28 = vmul.f32 1.442695, %v1123_v32  ;;  %v1189_v39 = vsel %vm1068_vm1, %v1726_v38, 0.0  ;;  %v1728_v59 = vpop.eup %1727 }
 0x20d   :  { %v1147_v26 = vmul.f32 1.442695, %v1124_v35  ;;  %v1113_v46 = vpop.xlane.xlu0 %1112  ;;  %1175 = vadd.xlane.f32.xlu1 %v1174_v5  ;;  %1190 = vadd.xlane.f32.xlu0 %v1189_v39  ;;  %v1198_v0 = vsel %vm1068_vm1, %v1728_v59, 0.0 }
 0x20e   :  { %v1116_v41 = vpop.xlane.xlu1 %1115  ;;  %v1131_v18 = vsub.f32 %v2868_v9, %v1113_v46 }
 0x20f   :  { %1741 = vpow2.f32 %v1147_v26  ;;  %v1132_v62 = vsub.f32 %v2866_v19, %v1116_v41 }
 0x210   :  { %v1730_v12 = vpop.eup %1729  ;;  %1743 = vpow2.f32 %v1145_v28  ;;  %v1161_v29 = vmul.f32 1.442695, %v1131_v18 }
 0x211   :  { %v1163_v50 = vmul.f32 1.442695, %v1132_v62  ;;  %v1171_v21 = vsel %vm1068_vm1, %v1730_v12, 0.0  ;;  %v1732_v45 = vpop.eup %1731  ;;  %1199 = vadd.xlane.f32.xlu1 %v1198_v0 }
 0x212   :  { %1172 = vadd.xlane.f32.xlu0 %v1171_v21  ;;  %v1195_v19 = vsel %vm1068_vm1, %v1732_v45, 0.0 }
 0x213   :  { %1745 = vpow2.f32 %v1163_v50 }
 0x214   :  { %v1734_v52 = vpop.eup %1733  ;;  %1747 = vpow2.f32 %v1161_v29 }
 0x215   :  { %v1180_v40 = vsel %vm1068_vm1, %v1734_v52, 0.0  ;;  %v1736_v23 = vpop.eup %1735 }
 0x216   :  { %1181 = vadd.xlane.f32.xlu1 %v1180_v40  ;;  %1196 = vadd.xlane.f32.xlu0 %v1195_v19  ;;  %v1177_v14 = vsel %vm1068_vm1, %v1736_v23, 0.0 }
 0x218   :  { %v1738_v9 = vpop.eup %1737 }
 0x219   :  { %v1204_v33 = vsel %vm1068_vm1, %v1738_v9, 0.0  ;;  %v1740_v16 = vpop.eup %1739 }
 0x21a   :  { %1205 = vadd.xlane.f32.xlu1 %v1204_v33  ;;  %1178 = vadd.xlane.f32.xlu0 %v1177_v14  ;;  %v1201_v3 = vsel %vm1068_vm1, %v1740_v16, 0.0 }
 0x21c   :  { %v1742_v36 = vpop.eup %1741 }
 0x21d   :  { %v1186_v8 = vsel %vm1068_vm1, %v1742_v36, 0.0  ;;  %v1744_v10 = vpop.eup %1743 }
 0x21e   :  { %1187 = vadd.xlane.f32.xlu1 %v1186_v8  ;;  %1202 = vadd.xlane.f32.xlu0 %v1201_v3  ;;  %v1183_v24 = vsel %vm1068_vm1, %v1744_v10, 0.0 }
 0x220   :  { %v1746_v53 = vpop.eup %1745 }
 0x221   :  { %v1210_v7 = vsel %vm1068_vm1, %v1746_v53, 0.0  ;;  %v1748_v30 = vpop.eup %1747 }
 0x222   :  { %1211 = vadd.xlane.f32.xlu1 %v1210_v7  ;;  %1184 = vadd.xlane.f32.xlu0 %v1183_v24  ;;  %v1207_v20 = vsel %vm1068_vm1, %v1748_v30, 0.0 }
 0x226   :  { %1208 = vadd.xlane.f32.xlu0 %v1207_v20 }
 0x28e   :  { %v1170_v42 = vpop.xlane.xlu1 %1169 }
 0x28f   :  { %1749 = vrcp.f32 %v1170_v42 }
 0x292   :  { %v1194_v13 = vpop.xlane.xlu1 %1193  ;;  %v1167_v54 = vpop.xlane.xlu0 %1166 }
 0x293   :  { %1751 = vrcp.f32 %v1194_v13 }
 0x294   :  { %1753 = vrcp.f32 %v1167_v54 }
 0x296   :  { %v1176_v31 = vpop.xlane.xlu1 %1175  ;;  %v1191_v25 = vpop.xlane.xlu0 %1190 }
 0x297   :  { %1755 = vrcp.f32 %v1176_v31 }
 0x298   :  { %1757 = vrcp.f32 %v1191_v25 }
 0x29a   :  { %v1200_v34 = vpop.xlane.xlu1 %1199 }
 0x29b   :  { %v1173_v51 = vpop.xlane.xlu0 %1172  ;;  %1759 = vrcp.f32 %v1200_v34 }
 0x29c   :  { %v1750_v22 = vpop.eup %1749  ;;  %1761 = vrcp.f32 %v1173_v51 }
 0x29f   :  { %v1182_v58 = vpop.xlane.xlu1 %1181  ;;  %v1197_v56 = vpop.xlane.xlu0 %1196 }
 0x2a0   :  { %1763 = vrcp.f32 %v1182_v58  ;;  %v1752_v47 = vpop.eup %1751 }
 0x2a1   :  { %1765 = vrcp.f32 %v1197_v56  ;;  %v1754_v44 = vpop.eup %1753 }
 0x2a2   :  { %v1214_v15 = vmul.f32 %v1754_v44, %v2891_v48 }
 0x2a3   :  { %v1206_v17 = vpop.xlane.xlu1 %1205  ;;  %v1179_v43 = vpop.xlane.xlu0 %1178 }
 0x2a4   :  { %1767 = vrcp.f32 %v1206_v17  ;;  %v1756_v27 = vpop.eup %1755  ;;  %vm1245_vm2 = vcmp.gt.f32.partialorder %v1214_v15, 0.5 }
 0x2a5   :  { %1769 = vrcp.f32 %v1179_v43  ;;  %v1758_v61 = vpop.eup %1757  ;;  %v1261_v37 = vsel %vm1245_vm2, 1.0, %v1781_v57 }
 0x2a6   :  { %1277 = vst.msk [vmem:[#allocation2] sm:$0xff] %vm1068_vm1, %v1261_v37 }
 0x2a7   :  { %v1188_v4 = vpop.xlane.xlu1 %1187  ;;  %v1203_v11 = vpop.xlane.xlu0 %1202 }
 0x2a8   :  { %1771 = vrcp.f32 %v1188_v4  ;;  %v1760_v2 = vpop.eup %1759 }
 0x2a9   :  { %1773 = vrcp.f32 %v1203_v11  ;;  %v1762_v6 = vpop.eup %1761 }
 0x2ab   :  { %v1212_v55 = vpop.xlane.xlu1 %1211  ;;  %v1185_v60 = vpop.xlane.xlu0 %1184 }
 0x2ac   :  { %1775 = vrcp.f32 %v1212_v55 }
 0x2ad   :  { %v1764_v48 = vpop.eup %1763  ;;  %1777 = vrcp.f32 %v1185_v60  ;;  %v1323_v1 = vld [vmem:[#allocation2] sm:$0xff] }
 0x2ae   :  { %v1766_v63 = vpop.eup %1765  ;;  %1324 = vst [vmem:[%s2921_s3] sm:$0xff] %v1323_v1 }
 0x2af   :  { %v1209_v49 = vpop.xlane.xlu0 %1208 }
 0x2b0   :  { %1779 = vrcp.f32 %v1209_v49 }
 0x2b1   :  { %v1768_v35 = vpop.eup %1767 }
 0x2b2   :  { %v1770_v32 = vpop.eup %1769 }
 0x2b5   :  { %v1772_v38 = vpop.eup %1771 }
 0x2b6   :  { %v1774_v26 = vpop.eup %1773 }
 0x2b9   :  { %v1776_v28 = vpop.eup %1775 }
 0x2ba   :  { %v1778_v41 = vpop.eup %1777 }
 0x2bd   :  { %v1780_v5 = vpop.eup %1779 }

</bundles_post_ra>
